<compile_context>
chip_gen: v7x
topology: tpu7x:2x2x1
jax: 0.10.0
libtpu: 0.0.40
codegen_flags: <defaults>
</compile_context>

<pallas_src>
import functools

import jax
import jax.numpy as jnp
from jax import lax
from jax.experimental import pallas as pl
from jax.experimental.pallas import tpu as pltpu

BN_EPS = 1e-5


def _bn_relu(z):
    """Training-mode BatchNorm1d (batch stats, gamma=1, beta=0) + ReLU, single-pass stats."""
    mean = jnp.mean(z, axis=0, keepdims=True)
    ex2 = jnp.mean(z * z, axis=0, keepdims=True)
    var = jnp.maximum(ex2 - mean * mean, 0.0)
    return jnp.maximum((z - mean) * lax.rsqrt(var + BN_EPS), 0.0)


def _dag_kernel(x_ref, idxr_ref, idxc_ref, wc_ref, bc_ref, w1_ref, b1_ref,
                wtw_ref, btw_ref, out_ref, ohg_ref, ohs_ref, cinv_ref):
    k = pl.program_id(0)
    N, C = x_ref.shape
    E3 = idxr_ref.shape[1]          # 3 * E
    E = E3 // 3

    # ---- one-time (k == 0): seed the resident output with x, build the two bf16 one-hot
    #      matrices and the f32 reciprocal walk counts (index-only, reused by every layer).
    @pl.when(k == 0)
    def _init():
        out_ref[...] = x_ref[...]
        # scatter orientation (N, 3E): ohs[n, p*E+e] == 1  iff  idx[p, e] == n
        row = lax.broadcasted_iota(jnp.int32, (N, E3), 0)
        ohs = (row == idxr_ref[...]).astype(jnp.float32)
        ohs_ref[...] = ohs.astype(jnp.bfloat16)                     # 0/1 exact in bf16
        # gather orientation (3E, N): makes the gather a plain (3E,N)@(N,C) matmul
        col = lax.broadcasted_iota(jnp.int32, (E3, N), 1)
        ohg_ref[...] = (col == idxc_ref[...]).astype(jnp.float32).astype(jnp.bfloat16)
        # per-destination walk counts (clamped to 1) -> f32 reciprocals, replicated over C lanes
        for p in range(3):
            cnt = jnp.sum(ohs[:, p * E:(p + 1) * E], axis=1, keepdims=True)     # (N, 1)
            cinv_ref[:, p * C:(p + 1) * C] = jnp.broadcast_to(
                1.0 / jnp.maximum(cnt, 1.0), (N, C))

    x = out_ref[...]                                  # (N, C) f32 running embedding
    xb = x.astype(jnp.bfloat16)                       # bf16 only at the MXU input

    # ---- gather of the three walk positions: G = OHg @ x -> (3E, C)
    G = jnp.dot(ohg_ref[...], xb, preferred_element_type=jnp.float32)
    G0, G1, G2 = G[0:E], G[E:2 * E], G[2 * E:3 * E]   # sublane-aligned when E % 8 == 0

    wc = wc_ref[...]                                  # (3C, 3C) = [W_T | W_M | W_B] columns
    w1 = w1_ref[...]                                  # (3C, 1)

    # ---- fused Linear for [F_T | F_M | F_B]; lane-dense width 3C (no +1 score column)
    Z = (jnp.dot(G0, wc[0:C], preferred_element_type=jnp.float32)
         + jnp.dot(G1, wc[C:2 * C], preferred_element_type=jnp.float32)
         + jnp.dot(G2, wc[2 * C:3 * C], preferred_element_type=jnp.float32)
         + bc_ref[...])                               # (E, 3C)
    A = _bn_relu(Z)                                   # (E, 3C)

    # ---- attention score (F_1): its own tiny matmuls, BN+ReLU, softmax over the E walks
    sz = (jnp.dot(G0, w1[0:C], preferred_element_type=jnp.float32)
          + jnp.dot(G1, w1[C:2 * C], preferred_element_type=jnp.float32)
          + jnp.dot(G2, w1[2 * C:3 * C], preferred_element_type=jnp.float32)
          + b1_ref[...])                              # (E, 1)
    sc = _bn_relu(sz)
    pnum = jnp.exp(sc - jnp.max(sc, axis=0, keepdims=True))
    # approx reciprocal: uniform positive scale on att (single scalar denominator); it cancels
    # exactly in the batch-stat BN of F_trans_TW below.
    att = pnum * pl.reciprocal(jnp.sum(pnum, axis=0, keepdims=True), approx=True)   # (E, 1)

    V = (att * A).astype(jnp.bfloat16)                # (E, 3C)

    # ---- scatter_mean: three block matmuls against E-wide one-hot column blocks,
    #      count-normalized afterwards in f32 (no concatenate, no pre-normalized matrix).
    m = (cinv_ref[:, 0:C]
         * jnp.dot(ohs_ref[:, 0:E], V[:, 0:C], preferred_element_type=jnp.float32)
         + cinv_ref[:, C:2 * C]
         * jnp.dot(ohs_ref[:, E:2 * E], V[:, C:2 * C], preferred_element_type=jnp.float32)
         + cinv_ref[:, 2 * C:3 * C]
         * jnp.dot(ohs_ref[:, 2 * E:3 * E], V[:, 2 * C:3 * C],
                   preferred_element_type=jnp.float32))            # (N, C)

    # ---- F_trans_TW (Linear C->C, BN over N, ReLU) + residual
    z = jnp.dot(m, wtw_ref[...], preferred_element_type=jnp.float32) + btw_ref[...]
    out_ref[...] = x + _bn_relu(z)


@jax.jit
def dag_embedding_forward(x, term_walk_index, params):
    """x: (N, C) f32, term_walk_index: (3, E) int32 in [0, N), params: list of K per-layer tuples."""
    N, C = x.shape
    E = term_walk_index.shape[1]
    E3 = 3 * E
    K = len(params)

    # NOTE: out-of-range indices silently produce zero gather rows / dropped scatter
    # contributions (unlike PyTorch, which would raise); callers should validate.
    idx_row = term_walk_index.reshape(1, E3).astype(jnp.int32)   # indices along lanes
    idx_col = term_walk_index.reshape(E3, 1).astype(jnp.int32)   # indices along sublanes

    # Stack per-layer weights along a leading K axis; fuse the three C-wide Linear weights
    # column-wise as [W_T | W_M | W_B] (score weight W_1 kept separate, see review).
    wc = jnp.stack([jnp.concatenate([wT, wM, wB], axis=1)
                    for (w1, b1, wT, bT, wM, bM, wB, bB, wtw, btw) in params])   # (K, 3C, 3C)
    bc = jnp.stack([jnp.concatenate([bT, bM, bB], axis=1)
                    for (w1, b1, wT, bT, wM, bM, wB, bB, wtw, btw) in params])   # (K, 1, 3C)
    w1s = jnp.stack([p[0] for p in params])                                      # (K, 3C, 1)
    b1s = jnp.stack([p[1] for p in params])                                      # (K, 1, 1)
    wtw = jnp.stack([p[8] for p in params])                                      # (K, C, C)
    btw = jnp.stack([p[9] for p in params])                                      # (K, 1, C)

    # VMEM budget: two bf16 one-hots + f32 reciprocal counts + resident (N,C) blocks +
    # double-buffered per-layer weights.  Explicit limit (v5e default scoped VMEM is 16 MiB),
    # capped below v7x's 64 MiB physical VMEM.
    est = (2 * N * E3 * 2 + N * 3 * C * 4 + 2 * N * C * 4 + 4 * E3 * 2
           + 2 * 4 * (9 * C * C + 6 * C + 3 * C + 1 + C * C + C))
    vmem_limit = int(min(48 * 1024 * 1024, max(32 * 1024 * 1024, 2 * est)))

    grid_spec = pltpu.PrefetchScalarGridSpec(
        num_scalar_prefetch=0,
        grid=(K,),
        in_specs=[
            pl.BlockSpec((N, C), lambda k: (0, 0)),                   # x (aliased to output)
            pl.BlockSpec((1, E3), lambda k: (0, 0)),                  # indices, lane layout
            pl.BlockSpec((E3, 1), lambda k: (0, 0)),                  # indices, sublane layout
            pl.BlockSpec((None, 3 * C, 3 * C), lambda k: (k, 0, 0)),  # [W_T|W_M|W_B] per layer
            pl.BlockSpec((None, 1, 3 * C), lambda k: (k, 0, 0)),      # [b_T|b_M|b_B] per layer
            pl.BlockSpec((None, 3 * C, 1), lambda k: (k, 0, 0)),      # W_1 per layer
            pl.BlockSpec((None, 1, 1), lambda k: (k, 0, 0)),          # b_1 per layer
            pl.BlockSpec((None, C, C), lambda k: (k, 0, 0)),          # W_trans_TW per layer
            pl.BlockSpec((None, 1, C), lambda k: (k, 0, 0)),          # b_trans_TW per layer
        ],
        out_specs=pl.BlockSpec((N, C), lambda k: (0, 0)),             # resident across all K
        scratch_shapes=[
            pltpu.VMEM((E3, N), jnp.bfloat16),      # gather one-hot (3E, N)
            pltpu.VMEM((N, E3), jnp.bfloat16),      # scatter one-hot (N, 3E)
            pltpu.VMEM((N, 3 * C), jnp.float32),    # reciprocal walk counts per position
        ],
    )
    return pl.pallas_call(
        _dag_kernel,
        out_shape=jax.ShapeDtypeStruct((N, C), jnp.float32),
        grid_spec=grid_spec,
        input_output_aliases={0: 0},                # x's buffer reused for the output
        compiler_params=pltpu.CompilerParams(
            dimension_semantics=("arbitrary",),      # layer k depends on layer k-1
            vmem_limit_bytes=vmem_limit),
    )(x, idx_row, idx_col, wc, bc, w1s, b1s, wtw, btw)


# ---------------- parameter init (deterministic, matches module shapes) ----------------
def init_params(key, C, K):
    """Per layer: F_1 (3C->1), F_T/F_M/F_B (3C->C), F_trans_TW (C->C); kaiming-normal W, zero b."""
    params = []
    for i in range(K):
        ks = jax.random.split(jax.random.fold_in(key, i), 5)

        def kaiming(k, fan_in, shape):
            return (jnp.sqrt(2.0 / fan_in) * jax.random.normal(k, shape)).astype(jnp.float32)

        w1 = kaiming(ks[0], 3 * C, (3 * C, 1));  b1 = jnp.zeros((1, 1), jnp.float32)
        wT = kaiming(ks[1], 3 * C, (3 * C, C));  bT = jnp.zeros((1, C), jnp.float32)
        wM = kaiming(ks[2], 3 * C, (3 * C, C));  bM = jnp.zeros((1, C), jnp.float32)
        wB = kaiming(ks[3], 3 * C, (3 * C, C));  bB = jnp.zeros((1, C), jnp.float32)
        wtw = kaiming(ks[4], C, (C, C));         btw = jnp.zeros((1, C), jnp.float32)
        params.append((w1, b1, wT, bT, wM, bM, wB, bB, wtw, btw))
    return params


# ---------------- plain-JAX reference (same math, different ops, pure f32) ----------------
def ref_forward(x, idx, params):
    N, C = x.shape

    def bn_relu(z):
        mean = jnp.mean(z, axis=0, keepdims=True)
        var = jnp.mean((z - mean) ** 2, axis=0, keepdims=True)
        return jnp.maximum((z - mean) * lax.rsqrt(var + BN_EPS), 0.0)

    for (w1, b1, wT, bT, wM, bM, wB, bB, wtw, btw) in params:
        feat = jnp.concatenate([x[idx[0]], x[idx[1]], x[idx[2]]], axis=1)
        score = bn_relu(feat @ w1 + b1)
        att = jax.nn.softmax(score, axis=0)

        def scatter_mean(vals, ind):
            s = jax.ops.segment_sum(vals, ind, num_segments=N)
            c = jax.ops.segment_sum(jnp.ones((vals.shape[0], 1), jnp.float32), ind, num_segments=N)
            return s / jnp.maximum(c, 1.0)

        m = scatter_mean(att * bn_relu(feat @ wT + bT), idx[0])
        m = m + scatter_mean(att * bn_relu(feat @ wM + bM), idx[1])
        m = m + scatter_mean(att * bn_relu(feat @ wB + bB), idx[2])
        x = x + bn_relu(m @ wtw + btw)
    return x


if __name__ == "__main__":
    N, C, E, K = 16, 32, 24, 2   # nodes, node_out_channels, term-walk triples, layers

    key = jax.random.PRNGKey(0)
    kx, ki, kp = jax.random.split(key, 3)
    x = jax.random.normal(kx, (N, C), dtype=jnp.float32)
    term_walk_index = jax.random.randint(ki, (3, E), 0, N, dtype=jnp.int32)
    params = init_params(kp, C, K)

    out = jax.block_until_ready(dag_embedding_forward(x, term_walk_index, params))
    ref = ref_forward(x, term_walk_index, params)

    assert out.shape == (N, C)
    # bf16 MXU inputs on the gather/scatter matmuls (perf-review item) cost ~1e-2 absolute
    # accuracy after the BN amplification stages; compare with a correspondingly relaxed
    # tolerance against the pure-f32 reference.
    assert jnp.allclose(out, ref, atol=5e-2, rtol=5e-2), "Pallas kernel mismatch vs reference"

    print("KERNEL_OK")
</pallas_src>

<mosaic_0001>
module attributes {stable_mosaic.version = 11 : i64} {
  func.func @_dag_kernel(%arg0: i32, %arg1: memref<16x32xf32, #tpu.memory_space<vmem>>, %arg2: memref<1x72xi32, #tpu.memory_space<vmem>>, %arg3: memref<72x1xi32, #tpu.memory_space<vmem>>, %arg4: memref<1x96x96xf32, #tpu.memory_space<vmem>>, %arg5: memref<1x1x96xf32, #tpu.memory_space<vmem>>, %arg6: memref<1x96x1xf32, #tpu.memory_space<vmem>>, %arg7: memref<1x1x1xf32, #tpu.memory_space<vmem>>, %arg8: memref<1x32x32xf32, #tpu.memory_space<vmem>>, %arg9: memref<1x1x32xf32, #tpu.memory_space<vmem>>, %arg10: memref<16x32xf32, #tpu.memory_space<vmem>>, %arg11: memref<72x16xbf16, #tpu.memory_space<vmem>>, %arg12: memref<16x72xbf16, #tpu.memory_space<vmem>>, %arg13: memref<16x96xf32, #tpu.memory_space<vmem>>) attributes {dimension_semantics = [#tpu.dimension_semantics<arbitrary>], iteration_bounds = array<i64: 2>, scalar_prefetch = 0 : i64, scratch_operands = 3 : i64, tpu.core_type = #tpu.core_type<tc>, window_params = [{pipeline_mode = #tpu.pipeline_mode<synchronous>, transform_indices = @transform_0, window_bounds = array<i64: 16, 32>}, {pipeline_mode = #tpu.pipeline_mode<synchronous>, transform_indices = @transform_1, window_bounds = array<i64: 1, 72>}, {pipeline_mode = #tpu.pipeline_mode<synchronous>, transform_indices = @transform_2, window_bounds = array<i64: 72, 1>}, {transform_indices = @transform_3, window_bounds = array<i64: 1, 96, 96>}, {transform_indices = @transform_4, window_bounds = array<i64: 1, 1, 96>}, {transform_indices = @transform_5, window_bounds = array<i64: 1, 96, 1>}, {transform_indices = @transform_6, window_bounds = array<i64: 1, 1, 1>}, {transform_indices = @transform_7, window_bounds = array<i64: 1, 32, 32>}, {transform_indices = @transform_8, window_bounds = array<i64: 1, 1, 32>}, {pipeline_mode = #tpu.pipeline_mode<synchronous>, transform_indices = @transform_9, window_bounds = array<i64: 16, 32>}]} {
    %c0_i32 = arith.constant 0 : i32
    %0 = arith.cmpi eq, %arg0, %c0_i32 : i32
    %1 = arith.extui %0 : i1 to i32
    %c0_i32_0 = arith.constant 0 : i32
    %2 = arith.cmpi ne, %1, %c0_i32_0 : i32
    scf.if %2 {
      %c0_65 = arith.constant 0 : index
      %c0_66 = arith.constant 0 : index
      %143 = vector.load %arg1[%c0_65, %c0_66] : memref<16x32xf32, #tpu.memory_space<vmem>>, vector<16x32xf32>
      %c0_67 = arith.constant 0 : index
      %c0_68 = arith.constant 0 : index
      %144 = vector.load %arg10[%c0_67, %c0_68] : memref<16x32xf32, #tpu.memory_space<vmem>>, vector<16x32xf32>
      tpu.vector_store %arg10[%c0_67, %c0_68], %143 {strides = array<i32>} : memref<16x32xf32, #tpu.memory_space<vmem>>, vector<16x32xf32>,
      %145 = tpu.iota {dimensions = array<i32: 0>} : vector<16x72xi32>
      %c0_69 = arith.constant 0 : index
      %c0_70 = arith.constant 0 : index
      %146 = vector.load %arg2[%c0_69, %c0_70] : memref<1x72xi32, #tpu.memory_space<vmem>>, vector<1x72xi32>
      %147 = vector.broadcast %146 : vector<1x72xi32> to vector<16x72xi32>
      %148 = arith.cmpi eq, %145, %147 : vector<16x72xi32>
      %149 = arith.extui %148 : vector<16x72xi1> to vector<16x72xi32>
      %150 = arith.sitofp %149 : vector<16x72xi32> to vector<16x72xf32>
      %151 = arith.truncf %150 : vector<16x72xf32> to vector<16x72xbf16>
      %c0_71 = arith.constant 0 : index
      %c0_72 = arith.constant 0 : index
      %152 = vector.load %arg12[%c0_71, %c0_72] : memref<16x72xbf16, #tpu.memory_space<vmem>>, vector<16x72xbf16>
      tpu.vector_store %arg12[%c0_71, %c0_72], %151 {strides = array<i32>} : memref<16x72xbf16, #tpu.memory_space<vmem>>, vector<16x72xbf16>,
      %153 = tpu.iota {dimensions = array<i32: 1>} : vector<72x16xi32>
      %c0_73 = arith.constant 0 : index
      %c0_74 = arith.constant 0 : index
      %154 = vector.load %arg3[%c0_73, %c0_74] : memref<72x1xi32, #tpu.memory_space<vmem>>, vector<72x1xi32>
      %155 = vector.broadcast %154 : vector<72x1xi32> to vector<72x16xi32>
      %156 = arith.cmpi eq, %153, %155 : vector<72x16xi32>
      %157 = arith.extui %156 : vector<72x16xi1> to vector<72x16xi32>
      %158 = arith.sitofp %157 : vector<72x16xi32> to vector<72x16xf32>
      %159 = arith.truncf %158 : vector<72x16xf32> to vector<72x16xbf16>
      %c0_75 = arith.constant 0 : index
      %c0_76 = arith.constant 0 : index
      %160 = vector.load %arg11[%c0_75, %c0_76] : memref<72x16xbf16, #tpu.memory_space<vmem>>, vector<72x16xbf16>
      tpu.vector_store %arg11[%c0_75, %c0_76], %159 {strides = array<i32>} : memref<72x16xbf16, #tpu.memory_space<vmem>>, vector<72x16xbf16>,
      %161 = vector.extract_strided_slice %150 {offsets = [0, 0], sizes = [16, 24], strides = [1, 1]} : vector<16x72xf32> to vector<16x24xf32>
      %cst_77 = arith.constant dense<0.000000e+00> : vector<16xf32>
      %162 = vector.multi_reduction <add>, %161, %cst_77 [1] : vector<16x24xf32> to vector<16xf32>
      %163 = vector.shape_cast %162 : vector<16xf32> to vector<16x1xf32>
      %cst_78 = arith.constant 1.000000e+00 : f32
      %164 = vector.broadcast %cst_78 : f32 to vector<16x1xf32>
      %165 = arith.maximumf %163, %164 : vector<16x1xf32>
      %cst_79 = arith.constant 1.000000e+00 : f32
      %166 = vector.broadcast %cst_79 : f32 to vector<16x1xf32>
      %167 = arith.divf %166, %165 : vector<16x1xf32>
      %168 = vector.shape_cast %167 : vector<16x1xf32> to vector<16x1xf32>
      %169 = vector.broadcast %168 : vector<16x1xf32> to vector<16x32xf32>
      %c0_80 = arith.constant 0 : index
      %c0_81 = arith.constant 0 : index
      %170 = vector.load %arg13[%c0_80, %c0_81] : memref<16x96xf32, #tpu.memory_space<vmem>>, vector<16x32xf32>
      tpu.vector_store %arg13[%c0_80, %c0_81], %169 {strides = array<i32>} : memref<16x96xf32, #tpu.memory_space<vmem>>, vector<16x32xf32>,
      %171 = vector.extract_strided_slice %150 {offsets = [0, 24], sizes = [16, 24], strides = [1, 1]} : vector<16x72xf32> to vector<16x24xf32>
      %cst_82 = arith.constant dense<0.000000e+00> : vector<16xf32>
      %172 = vector.multi_reduction <add>, %171, %cst_82 [1] : vector<16x24xf32> to vector<16xf32>
      %173 = vector.shape_cast %172 : vector<16xf32> to vector<16x1xf32>
      %cst_83 = arith.constant 1.000000e+00 : f32
      %174 = vector.broadcast %cst_83 : f32 to vector<16x1xf32>
      %175 = arith.maximumf %173, %174 : vector<16x1xf32>
      %cst_84 = arith.constant 1.000000e+00 : f32
      %176 = vector.broadcast %cst_84 : f32 to vector<16x1xf32>
      %177 = arith.divf %176, %175 : vector<16x1xf32>
      %178 = vector.shape_cast %177 : vector<16x1xf32> to vector<16x1xf32>
      %179 = vector.broadcast %178 : vector<16x1xf32> to vector<16x32xf32>
      %c0_85 = arith.constant 0 : index
      %c32_86 = arith.constant 32 : index
      %180 = vector.load %arg13[%c0_85, %c32_86] : memref<16x96xf32, #tpu.memory_space<vmem>>, vector<16x32xf32>
      tpu.vector_store %arg13[%c0_85, %c32_86], %179 {strides = array<i32>} : memref<16x96xf32, #tpu.memory_space<vmem>>, vector<16x32xf32>,
      %181 = vector.extract_strided_slice %150 {offsets = [0, 48], sizes = [16, 24], strides = [1, 1]} : vector<16x72xf32> to vector<16x24xf32>
      %cst_87 = arith.constant dense<0.000000e+00> : vector<16xf32>
      %182 = vector.multi_reduction <add>, %181, %cst_87 [1] : vector<16x24xf32> to vector<16xf32>
      %183 = vector.shape_cast %182 : vector<16xf32> to vector<16x1xf32>
      %cst_88 = arith.constant 1.000000e+00 : f32
      %184 = vector.broadcast %cst_88 : f32 to vector<16x1xf32>
      %185 = arith.maximumf %183, %184 : vector<16x1xf32>
      %cst_89 = arith.constant 1.000000e+00 : f32
      %186 = vector.broadcast %cst_89 : f32 to vector<16x1xf32>
      %187 = arith.divf %186, %185 : vector<16x1xf32>
      %188 = vector.shape_cast %187 : vector<16x1xf32> to vector<16x1xf32>
      %189 = vector.broadcast %188 : vector<16x1xf32> to vector<16x32xf32>
      %c0_90 = arith.constant 0 : index
      %c64_91 = arith.constant 64 : index
      %190 = vector.load %arg13[%c0_90, %c64_91] : memref<16x96xf32, #tpu.memory_space<vmem>>, vector<16x32xf32>
      tpu.vector_store %arg13[%c0_90, %c64_91], %189 {strides = array<i32>} : memref<16x96xf32, #tpu.memory_space<vmem>>, vector<16x32xf32>,
    } else {
    }
    %c0 = arith.constant 0 : index
    %c0_1 = arith.constant 0 : index
    %3 = vector.load %arg10[%c0, %c0_1] : memref<16x32xf32, #tpu.memory_space<vmem>>, vector<16x32xf32>
    %4 = arith.truncf %3 : vector<16x32xf32> to vector<16x32xbf16>
    %c0_2 = arith.constant 0 : index
    %c0_3 = arith.constant 0 : index
    %5 = vector.load %arg11[%c0_2, %c0_3] : memref<72x16xbf16, #tpu.memory_space<vmem>>, vector<72x16xbf16>
    %cst = arith.constant dense<0.000000e+00> : vector<72x32xf32>
    %6 = tpu.matmul %5, %4, %cst {dimension_numbers = #tpu.dot_dimension_numbers<[1], [0], [0], [1], [0, 0, 1, 1], [], []>} : vector<72x16xbf16>, vector<16x32xbf16>, vector<72x32xf32> -> vector<72x32xf32>
    %7 = vector.extract_strided_slice %6 {offsets = [0, 0], sizes = [24, 32], strides = [1, 1]} : vector<72x32xf32> to vector<24x32xf32>
    %8 = vector.extract_strided_slice %6 {offsets = [24, 0], sizes = [24, 32], strides = [1, 1]} : vector<72x32xf32> to vector<24x32xf32>
    %9 = vector.extract_strided_slice %6 {offsets = [48, 0], sizes = [24, 32], strides = [1, 1]} : vector<72x32xf32> to vector<24x32xf32>
    %c0_4 = arith.constant 0 : index
    %c0_5 = arith.constant 0 : index
    %c0_6 = arith.constant 0 : index
    %10 = vector.load %arg4[%c0_4, %c0_5, %c0_6] : memref<1x96x96xf32, #tpu.memory_space<vmem>>, vector<1x96x96xf32>
    %11 = vector.shape_cast %10 : vector<1x96x96xf32> to vector<96x96xf32>
    %c0_7 = arith.constant 0 : index
    %c0_8 = arith.constant 0 : index
    %c0_9 = arith.constant 0 : index
    %12 = vector.load %arg6[%c0_7, %c0_8, %c0_9] : memref<1x96x1xf32, #tpu.memory_space<vmem>>, vector<1x96x1xf32>
    %13 = vector.shape_cast %12 : vector<1x96x1xf32> to vector<96x1xf32>
    %14 = vector.extract_strided_slice %11 {offsets = [0, 0], sizes = [32, 96], strides = [1, 1]} : vector<96x96xf32> to vector<32x96xf32>
    %cst_10 = arith.constant dense<0.000000e+00> : vector<24x96xf32>
    %15 = tpu.matmul %7, %14, %cst_10 {dimension_numbers = #tpu.dot_dimension_numbers<[1], [0], [0], [1], [0, 0, 1, 1], [], []>} : vector<24x32xf32>, vector<32x96xf32>, vector<24x96xf32> -> vector<24x96xf32>
    %16 = vector.extract_strided_slice %11 {offsets = [32, 0], sizes = [32, 96], strides = [1, 1]} : vector<96x96xf32> to vector<32x96xf32>
    %cst_11 = arith.constant dense<0.000000e+00> : vector<24x96xf32>
    %17 = tpu.matmul %8, %16, %cst_11 {dimension_numbers = #tpu.dot_dimension_numbers<[1], [0], [0], [1], [0, 0, 1, 1], [], []>} : vector<24x32xf32>, vector<32x96xf32>, vector<24x96xf32> -> vector<24x96xf32>
    %18 = arith.addf %15, %17 : vector<24x96xf32>
    %19 = vector.extract_strided_slice %11 {offsets = [64, 0], sizes = [32, 96], strides = [1, 1]} : vector<96x96xf32> to vector<32x96xf32>
    %cst_12 = arith.constant dense<0.000000e+00> : vector<24x96xf32>
    %20 = tpu.matmul %9, %19, %cst_12 {dimension_numbers = #tpu.dot_dimension_numbers<[1], [0], [0], [1], [0, 0, 1, 1], [], []>} : vector<24x32xf32>, vector<32x96xf32>, vector<24x96xf32> -> vector<24x96xf32>
    %21 = arith.addf %18, %20 : vector<24x96xf32>
    %c0_13 = arith.constant 0 : index
    %c0_14 = arith.constant 0 : index
    %c0_15 = arith.constant 0 : index
    %22 = vector.load %arg5[%c0_13, %c0_14, %c0_15] : memref<1x1x96xf32, #tpu.memory_space<vmem>>, vector<1x1x96xf32>
    %23 = vector.shape_cast %22 : vector<1x1x96xf32> to vector<1x96xf32>
    %24 = vector.broadcast %23 : vector<1x96xf32> to vector<24x96xf32>
    %25 = arith.addf %21, %24 : vector<24x96xf32>
    %cst_16 = arith.constant dense<0.000000e+00> : vector<96xf32>
    %26 = vector.multi_reduction <add>, %25, %cst_16 [0] : vector<24x96xf32> to vector<96xf32>
    %27 = vector.shape_cast %26 : vector<96xf32> to vector<1x96xf32>
    %cst_17 = arith.constant 2.400000e+01 : f32
    %28 = vector.broadcast %cst_17 : f32 to vector<1x96xf32>
    %29 = arith.divf %27, %28 : vector<1x96xf32>
    %30 = arith.mulf %25, %25 : vector<24x96xf32>
    %cst_18 = arith.constant dense<0.000000e+00> : vector<96xf32>
    %31 = vector.multi_reduction <add>, %30, %cst_18 [0] : vector<24x96xf32> to vector<96xf32>
    %32 = vector.shape_cast %31 : vector<96xf32> to vector<1x96xf32>
    %cst_19 = arith.constant 2.400000e+01 : f32
    %33 = vector.broadcast %cst_19 : f32 to vector<1x96xf32>
    %34 = arith.divf %32, %33 : vector<1x96xf32>
    %35 = arith.mulf %29, %29 : vector<1x96xf32>
    %36 = arith.subf %34, %35 : vector<1x96xf32>
    %cst_20 = arith.constant 0.000000e+00 : f32
    %37 = vector.broadcast %cst_20 : f32 to vector<1x96xf32>
    %38 = arith.maximumf %36, %37 : vector<1x96xf32>
    %39 = vector.broadcast %29 : vector<1x96xf32> to vector<24x96xf32>
    %40 = arith.subf %25, %39 : vector<24x96xf32>
    %cst_21 = arith.constant 9.99999974E-6 : f32
    %41 = vector.broadcast %cst_21 : f32 to vector<1x96xf32>
    %42 = arith.addf %38, %41 : vector<1x96xf32>
    %43 = math.rsqrt %42 : vector<1x96xf32>
    %44 = vector.broadcast %43 : vector<1x96xf32> to vector<24x96xf32>
    %45 = arith.mulf %40, %44 : vector<24x96xf32>
    %cst_22 = arith.constant 0.000000e+00 : f32
    %46 = vector.broadcast %cst_22 : f32 to vector<24x96xf32>
    %47 = arith.maximumf %45, %46 : vector<24x96xf32>
    %48 = vector.extract_strided_slice %13 {offsets = [0, 0], sizes = [32, 1], strides = [1, 1]} : vector<96x1xf32> to vector<32x1xf32>
    %cst_23 = arith.constant dense<0.000000e+00> : vector<24x1xf32>
    %49 = tpu.matmul %7, %48, %cst_23 {dimension_numbers = #tpu.dot_dimension_numbers<[1], [0], [0], [1], [0, 0, 1, 1], [], []>} : vector<24x32xf32>, vector<32x1xf32>, vector<24x1xf32> -> vector<24x1xf32>
    %50 = vector.extract_strided_slice %13 {offsets = [32, 0], sizes = [32, 1], strides = [1, 1]} : vector<96x1xf32> to vector<32x1xf32>
    %cst_24 = arith.constant dense<0.000000e+00> : vector<24x1xf32>
    %51 = tpu.matmul %8, %50, %cst_24 {dimension_numbers = #tpu.dot_dimension_numbers<[1], [0], [0], [1], [0, 0, 1, 1], [], []>} : vector<24x32xf32>, vector<32x1xf32>, vector<24x1xf32> -> vector<24x1xf32>
    %52 = arith.addf %49, %51 : vector<24x1xf32>
    %53 = vector.extract_strided_slice %13 {offsets = [64, 0], sizes = [32, 1], strides = [1, 1]} : vector<96x1xf32> to vector<32x1xf32>
    %cst_25 = arith.constant dense<0.000000e+00> : vector<24x1xf32>
    %54 = tpu.matmul %9, %53, %cst_25 {dimension_numbers = #tpu.dot_dimension_numbers<[1], [0], [0], [1], [0, 0, 1, 1], [], []>} : vector<24x32xf32>, vector<32x1xf32>, vector<24x1xf32> -> vector<24x1xf32>
    %55 = arith.addf %52, %54 : vector<24x1xf32>
    %c0_26 = arith.constant 0 : index
    %c0_27 = arith.constant 0 : index
    %c0_28 = arith.constant 0 : index
    %56 = vector.load %arg7[%c0_26, %c0_27, %c0_28] : memref<1x1x1xf32, #tpu.memory_space<vmem>>, vector<1x1x1xf32>
    %57 = vector.shape_cast %56 : vector<1x1x1xf32> to vector<1x1xf32>
    %58 = vector.broadcast %57 : vector<1x1xf32> to vector<24x1xf32>
    %59 = arith.addf %55, %58 : vector<24x1xf32>
    %cst_29 = arith.constant dense<0.000000e+00> : vector<1xf32>
    %60 = vector.multi_reduction <add>, %59, %cst_29 [0] : vector<24x1xf32> to vector<1xf32>
    %61 = vector.shape_cast %60 : vector<1xf32> to vector<1x1xf32>
    %cst_30 = arith.constant 2.400000e+01 : f32
    %62 = vector.broadcast %cst_30 : f32 to vector<1x1xf32>
    %63 = arith.divf %61, %62 : vector<1x1xf32>
    %64 = arith.mulf %59, %59 : vector<24x1xf32>
    %cst_31 = arith.constant dense<0.000000e+00> : vector<1xf32>
    %65 = vector.multi_reduction <add>, %64, %cst_31 [0] : vector<24x1xf32> to vector<1xf32>
    %66 = vector.shape_cast %65 : vector<1xf32> to vector<1x1xf32>
    %cst_32 = arith.constant 2.400000e+01 : f32
    %67 = vector.broadcast %cst_32 : f32 to vector<1x1xf32>
    %68 = arith.divf %66, %67 : vector<1x1xf32>
    %69 = arith.mulf %63, %63 : vector<1x1xf32>
    %70 = arith.subf %68, %69 : vector<1x1xf32>
    %cst_33 = arith.constant 0.000000e+00 : f32
    %71 = vector.broadcast %cst_33 : f32 to vector<1x1xf32>
    %72 = arith.maximumf %70, %71 : vector<1x1xf32>
    %73 = vector.broadcast %63 : vector<1x1xf32> to vector<24x1xf32>
    %74 = arith.subf %59, %73 : vector<24x1xf32>
    %cst_34 = arith.constant 9.99999974E-6 : f32
    %75 = vector.broadcast %cst_34 : f32 to vector<1x1xf32>
    %76 = arith.addf %72, %75 : vector<1x1xf32>
    %77 = math.rsqrt %76 : vector<1x1xf32>
    %78 = vector.broadcast %77 : vector<1x1xf32> to vector<24x1xf32>
    %79 = arith.mulf %74, %78 : vector<24x1xf32>
    %cst_35 = arith.constant 0.000000e+00 : f32
    %80 = vector.broadcast %cst_35 : f32 to vector<24x1xf32>
    %81 = arith.maximumf %79, %80 : vector<24x1xf32>
    %cst_36 = arith.constant dense<0xFF800000> : vector<1xf32>
    %82 = vector.multi_reduction <maximumf>, %81, %cst_36 [0] : vector<24x1xf32> to vector<1xf32>
    %83 = vector.shape_cast %82 : vector<1xf32> to vector<1x1xf32>
    %84 = vector.broadcast %83 : vector<1x1xf32> to vector<24x1xf32>
    %85 = arith.subf %81, %84 : vector<24x1xf32>
    %86 = math.exp %85 : vector<24x1xf32>
    %cst_37 = arith.constant dense<0.000000e+00> : vector<1xf32>
    %87 = vector.multi_reduction <add>, %86, %cst_37 [0] : vector<24x1xf32> to vector<1xf32>
    %88 = vector.shape_cast %87 : vector<1xf32> to vector<1x1xf32>
    %89 = tpu.reciprocal %88 {approx = true} : vector<1x1xf32> -> vector<1x1xf32>
    %90 = vector.broadcast %89 : vector<1x1xf32> to vector<24x1xf32>
    %91 = arith.mulf %86, %90 : vector<24x1xf32>
    %92 = vector.broadcast %91 : vector<24x1xf32> to vector<24x96xf32>
    %93 = arith.mulf %92, %47 : vector<24x96xf32>
    %94 = arith.truncf %93 : vector<24x96xf32> to vector<24x96xbf16>
    %c0_38 = arith.constant 0 : index
    %c0_39 = arith.constant 0 : index
    %95 = vector.load %arg13[%c0_38, %c0_39] : memref<16x96xf32, #tpu.memory_space<vmem>>, vector<16x32xf32>
    %c0_40 = arith.constant 0 : index
    %c0_41 = arith.constant 0 : index
    %96 = vector.load %arg12[%c0_40, %c0_41] : memref<16x72xbf16, #tpu.memory_space<vmem>>, vector<16x24xbf16>
    %97 = vector.extract_strided_slice %94 {offsets = [0, 0], sizes = [24, 32], strides = [1, 1]} : vector<24x96xbf16> to vector<24x32xbf16>
    %cst_42 = arith.constant dense<0.000000e+00> : vector<16x32xf32>
    %98 = tpu.matmul %96, %97, %cst_42 {dimension_numbers = #tpu.dot_dimension_numbers<[1], [0], [0], [1], [0, 0, 1, 1], [], []>} : vector<16x24xbf16>, vector<24x32xbf16>, vector<16x32xf32> -> vector<16x32xf32>
    %99 = arith.mulf %95, %98 : vector<16x32xf32>
    %c0_43 = arith.constant 0 : index
    %c32 = arith.constant 32 : index
    %100 = vector.load %arg13[%c0_43, %c32] : memref<16x96xf32, #tpu.memory_space<vmem>>, vector<16x32xf32>
    %c0_44 = arith.constant 0 : index
    %c24 = arith.constant 24 : index
    %101 = vector.load %arg12[%c0_44, %c24] : memref<16x72xbf16, #tpu.memory_space<vmem>>, vector<16x24xbf16>
    %102 = vector.extract_strided_slice %94 {offsets = [0, 32], sizes = [24, 32], strides = [1, 1]} : vector<24x96xbf16> to vector<24x32xbf16>
    %cst_45 = arith.constant dense<0.000000e+00> : vector<16x32xf32>
    %103 = tpu.matmul %101, %102, %cst_45 {dimension_numbers = #tpu.dot_dimension_numbers<[1], [0], [0], [1], [0, 0, 1, 1], [], []>} : vector<16x24xbf16>, vector<24x32xbf16>, vector<16x32xf32> -> vector<16x32xf32>
    %104 = arith.mulf %100, %103 : vector<16x32xf32>
    %105 = arith.addf %99, %104 : vector<16x32xf32>
    %c0_46 = arith.constant 0 : index
    %c64 = arith.constant 64 : index
    %106 = vector.load %arg13[%c0_46, %c64] : memref<16x96xf32, #tpu.memory_space<vmem>>, vector<16x32xf32>
    %c0_47 = arith.constant 0 : index
    %c48 = arith.constant 48 : index
    %107 = vector.load %arg12[%c0_47, %c48] : memref<16x72xbf16, #tpu.memory_space<vmem>>, vector<16x24xbf16>
    %108 = vector.extract_strided_slice %94 {offsets = [0, 64], sizes = [24, 32], strides = [1, 1]} : vector<24x96xbf16> to vector<24x32xbf16>
    %cst_48 = arith.constant dense<0.000000e+00> : vector<16x32xf32>
    %109 = tpu.matmul %107, %108, %cst_48 {dimension_numbers = #tpu.dot_dimension_numbers<[1], [0], [0], [1], [0, 0, 1, 1], [], []>} : vector<16x24xbf16>, vector<24x32xbf16>, vector<16x32xf32> -> vector<16x32xf32>
    %110 = arith.mulf %106, %109 : vector<16x32xf32>
    %111 = arith.addf %105, %110 : vector<16x32xf32>
    %c0_49 = arith.constant 0 : index
    %c0_50 = arith.constant 0 : index
    %c0_51 = arith.constant 0 : index
    %112 = vector.load %arg8[%c0_49, %c0_50, %c0_51] : memref<1x32x32xf32, #tpu.memory_space<vmem>>, vector<1x32x32xf32>
    %113 = vector.shape_cast %112 : vector<1x32x32xf32> to vector<32x32xf32>
    %cst_52 = arith.constant dense<0.000000e+00> : vector<16x32xf32>
    %114 = tpu.matmul %111, %113, %cst_52 {dimension_numbers = #tpu.dot_dimension_numbers<[1], [0], [0], [1], [0, 0, 1, 1], [], []>} : vector<16x32xf32>, vector<32x32xf32>, vector<16x32xf32> -> vector<16x32xf32>
    %c0_53 = arith.constant 0 : index
    %c0_54 = arith.constant 0 : index
    %c0_55 = arith.constant 0 : index
    %115 = vector.load %arg9[%c0_53, %c0_54, %c0_55] : memref<1x1x32xf32, #tpu.memory_space<vmem>>, vector<1x1x32xf32>
    %116 = vector.shape_cast %115 : vector<1x1x32xf32> to vector<1x32xf32>
    %117 = vector.broadcast %116 : vector<1x32xf32> to vector<16x32xf32>
    %118 = arith.addf %114, %117 : vector<16x32xf32>
    %cst_56 = arith.constant dense<0.000000e+00> : vector<32xf32>
    %119 = vector.multi_reduction <add>, %118, %cst_56 [0] : vector<16x32xf32> to vector<32xf32>
    %120 = vector.shape_cast %119 : vector<32xf32> to vector<1x32xf32>
    %cst_57 = arith.constant 1.600000e+01 : f32
    %121 = vector.broadcast %cst_57 : f32 to vector<1x32xf32>
    %122 = arith.divf %120, %121 : vector<1x32xf32>
    %123 = arith.mulf %118, %118 : vector<16x32xf32>
    %cst_58 = arith.constant dense<0.000000e+00> : vector<32xf32>
    %124 = vector.multi_reduction <add>, %123, %cst_58 [0] : vector<16x32xf32> to vector<32xf32>
    %125 = vector.shape_cast %124 : vector<32xf32> to vector<1x32xf32>
    %cst_59 = arith.constant 1.600000e+01 : f32
    %126 = vector.broadcast %cst_59 : f32 to vector<1x32xf32>
    %127 = arith.divf %125, %126 : vector<1x32xf32>
    %128 = arith.mulf %122, %122 : vector<1x32xf32>
    %129 = arith.subf %127, %128 : vector<1x32xf32>
    %cst_60 = arith.constant 0.000000e+00 : f32
    %130 = vector.broadcast %cst_60 : f32 to vector<1x32xf32>
    %131 = arith.maximumf %129, %130 : vector<1x32xf32>
    %132 = vector.broadcast %122 : vector<1x32xf32> to vector<16x32xf32>
    %133 = arith.subf %118, %132 : vector<16x32xf32>
    %cst_61 = arith.constant 9.99999974E-6 : f32
    %134 = vector.broadcast %cst_61 : f32 to vector<1x32xf32>
    %135 = arith.addf %131, %134 : vector<1x32xf32>
    %136 = math.rsqrt %135 : vector<1x32xf32>
    %137 = vector.broadcast %136 : vector<1x32xf32> to vector<16x32xf32>
    %138 = arith.mulf %133, %137 : vector<16x32xf32>
    %cst_62 = arith.constant 0.000000e+00 : f32
    %139 = vector.broadcast %cst_62 : f32 to vector<16x32xf32>
    %140 = arith.maximumf %138, %139 : vector<16x32xf32>
    %141 = arith.addf %3, %140 : vector<16x32xf32>
    %c0_63 = arith.constant 0 : index
    %c0_64 = arith.constant 0 : index
    %142 = vector.load %arg10[%c0_63, %c0_64] : memref<16x32xf32, #tpu.memory_space<vmem>>, vector<16x32xf32>
    tpu.vector_store %arg10[%c0_63, %c0_64], %141 {strides = array<i32>} : memref<16x32xf32, #tpu.memory_space<vmem>>, vector<16x32xf32>,
    return
  }
  func.func @transform_0(%arg0: i32) -> (i32, i32) {
    %c0_i32 = arith.constant 0 : i32
    %c0_i32_0 = arith.constant 0 : i32
    %c0_i32_1 = arith.constant 0 : i32
    return %c0_i32, %c0_i32_0 : i32, i32
  }
  func.func @transform_1(%arg0: i32) -> (i32, i32) {
    %c0_i32 = arith.constant 0 : i32
    %c0_i32_0 = arith.constant 0 : i32
    %c0_i32_1 = arith.constant 0 : i32
    return %c0_i32, %c0_i32_0 : i32, i32
  }
  func.func @transform_2(%arg0: i32) -> (i32, i32) {
    %c0_i32 = arith.constant 0 : i32
    %c0_i32_0 = arith.constant 0 : i32
    %c0_i32_1 = arith.constant 0 : i32
    return %c0_i32, %c0_i32_0 : i32, i32
  }
  func.func @transform_3(%arg0: i32) -> (i32, i32, i32) {
    %c0_i32 = arith.constant 0 : i32
    %c0_i32_0 = arith.constant 0 : i32
    %c0_i32_1 = arith.constant 0 : i32
    return %arg0, %c0_i32, %c0_i32_0 : i32, i32, i32
  }
  func.func @transform_4(%arg0: i32) -> (i32, i32, i32) {
    %c0_i32 = arith.constant 0 : i32
    %c0_i32_0 = arith.constant 0 : i32
    %c0_i32_1 = arith.constant 0 : i32
    return %arg0, %c0_i32, %c0_i32_0 : i32, i32, i32
  }
  func.func @transform_5(%arg0: i32) -> (i32, i32, i32) {
    %c0_i32 = arith.constant 0 : i32
    %c0_i32_0 = arith.constant 0 : i32
    %c0_i32_1 = arith.constant 0 : i32
    return %arg0, %c0_i32, %c0_i32_0 : i32, i32, i32
  }
  func.func @transform_6(%arg0: i32) -> (i32, i32, i32) {
    %c0_i32 = arith.constant 0 : i32
    %c0_i32_0 = arith.constant 0 : i32
    %c0_i32_1 = arith.constant 0 : i32
    return %arg0, %c0_i32, %c0_i32_0 : i32, i32, i32
  }
  func.func @transform_7(%arg0: i32) -> (i32, i32, i32) {
    %c0_i32 = arith.constant 0 : i32
    %c0_i32_0 = arith.constant 0 : i32
    %c0_i32_1 = arith.constant 0 : i32
    return %arg0, %c0_i32, %c0_i32_0 : i32, i32, i32
  }
  func.func @transform_8(%arg0: i32) -> (i32, i32, i32) {
    %c0_i32 = arith.constant 0 : i32
    %c0_i32_0 = arith.constant 0 : i32
    %c0_i32_1 = arith.constant 0 : i32
    return %arg0, %c0_i32, %c0_i32_0 : i32, i32, i32
  }
  func.func @transform_9(%arg0: i32) -> (i32, i32) {
    %c0_i32 = arith.constant 0 : i32
    %c0_i32_0 = arith.constant 0 : i32
    %c0_i32_1 = arith.constant 0 : i32
    return %c0_i32, %c0_i32_0 : i32, i32
  }
}

</mosaic_0001>

<bundles_post_ra>
// kernel: dag_embedding_forward.1
= control target key start
LH: loop header
LB: loop body
LE: loop exit
PB: predicated region body
PF: predicated region fallthrough
CT: control target
= control target key end

     0   :  { %14 = vsyncpa [#allocation6], 0  ;;  %s2869_s0 = inlined_call_operand.hbm [shape: f32[16,32], index: 0, kind: input, shape index: {}, may-alias: {0,9}]   ;;  %s2870_s1 = inlined_call_operand.vmem [shape: s32[1,72], index: 1, kind: input, shape index: {}]   ;;  %s2871_s2 = inlined_call_operand.vmem [shape: s32[72,1], index: 2, kind: input, shape index: {}]   ;;  %s2872_s3 = inlined_call_operand.vmem [shape: f32[2,96,96], index: 3, kind: input, shape index: {}]   ;;  %s2873_s4 = inlined_call_operand.vmem [shape: f32[2,1,96], index: 4, kind: input, shape index: {}]   ;;  %s2874_s5 = inlined_call_operand.vmem [shape: f32[2,96,1], index: 5, kind: input, shape index: {}]   ;;  %s2875_s6 = inlined_call_operand.vmem [shape: f32[2,1,1], index: 6, kind: input, shape index: {}]   ;;  %s2876_s7 = inlined_call_operand.vmem [shape: f32[2,32,32], index: 7, kind: input, shape index: {}]   ;;  %s2877_s8 = inlined_call_operand.vmem [shape: f32[2,1,32], index: 8, kind: input, shape index: {}]   ;;  %s2878_s9 = inlined_call_operand.hbm [shape: f32[16,32], index: 9, kind: output, shape index: {}, may-alias: {0,9}]  }
   0x1   :  { %15 = vsyncpa [#allocation7], 0  ;;  %s2457_s30 = smov 0  }
   0x2 LB: > { %s2463_s10 = sadd.s32 4294967295, %s2386_s30   ;;  %p1882_p0 = scmp.ge.s32.totalorder %s2386_s30, 1  ;;  %s2386_s30 = sphi %s2457_s30, %s21_s30  }
   0x3   : > { %p266_p1 = scmp.lt.s32.totalorder %s2386_s30, 3  ;;  %s2388_s11 = smov [#allocation5]  }
   0x4   : > { %s278_s12 = sshll.u32 %s2388_s11, 4  ;;  %p2879_p4 = scmp.eq.s32.totalorder %s2463_s10, 0  ;;  %s279_s12 = int_to_ptr.vmem [resolvable:$true] %s278_s12 }
   0x5   : > { %p2468_p3 = pnand %p1882_p0, %p266_p1  ;;  %s2318_s17 = scalar_lea.hbm %s2869_s0, 256 }
   0x6   : > { %p2319_p7 = scmp.ne.s32.totalorder %s2869_s0, %s2318_s17  ;;  %p2325_p11 = scmp.lt.u32.totalorder %s2318_s17, %s2869_s0 }
   0x7   : > { %s2881_s13 = scalar_select %p2468_p3, 1, 0 }
   0x8   : > { %p2238_p5 = pneg %p2468_p3 }
   0xa   : > { %p2477_p6 = pnand %p2879_p4, %p2238_p5 }
   0xc   : > { %p2320_p8 = pneg %p2477_p6 }
   0xe   : > { %p2321_p9 = pnand %p2320_p8, %p2319_p7 }
  0x10   : > { %p2322_p10 = pneg %p2321_p9 }
  0x12   : > { %p2327_p12 = pnand %p2325_p11, %p2322_p10 }
  0x14   : > { %2330 = shalt.err (!%p2327_p12)
}
  0x15   : > { %s2331_s22 = scalar_lea.vmem %s279_s12, 256  ;;  %p2339_p5 = scmp.lt.s32.totalorder %s279_s12, %s279_s12 }
  0x16   : > { %p2332_p13 = scmp.ne.s32.totalorder %s279_s12, %s2331_s22  ;;  %p2340_p2 = scmp.lt.s32.totalorder %s2331_s22, %s2331_s22 }
  0x18   : > { %p2334_p0 = pnand %p2332_p13, %p2320_p8  ;;  %p2341_p4 = por %p2340_p2, %p2339_p5 }
  0x1a   : > { %p2335_p1 = pneg %p2334_p0 }
  0x1c   : > { %p2342_p3 = pnand %p2341_p4, %p2335_p1 }
  0x1e   : > { %2345 = shalt.err (!%p2342_p3)
}
  0x1f   : > { %s2389_s23 = smov 128   ;;  %s2390_s24 = smov 8  }
  0x20   : > { %2241 = dma.hbm_to_vmem [thread:$0]  (!%p2477_p6), %s2869_s0, 256, %s279_s12, [#allocation6], %s2389_s23, %s2389_s23, %s2390_s24  }
  0x21   : > { %p2883_p7 = scmp.ne.s32.totalorder %s2881_s13, 0 }
  0x22   : > { %p2884_p9 = scmp.eq.s32.totalorder (!%p2883_p7), %s2463_s10, 0 }
  0x23   : > { %342 = sbr.rel (%p2883_p7) target bundleno = 1918 (0x77e), region = 56 }
  0x2a   : > { %2377 = dma.done.wait (%p2884_p9), [#allocation6], 256   ;;  %p2885_p8 = pmov %p2884_p9 }
  0x2b   : > { %p392_p2 = scmp.lt.s32.totalorder %s2463_s10, 1  ;;  %p2886_p3 = scmp.ne.s32.totalorder %s2463_s10, 0 }
  0x2c   : > { %2379 = vsyncadd (%p2885_p8), [#allocation6], 4294967040  ;;  %v426_v0 = vlaneseq (!%p2886_p3)  ;;  %v1892_v1 = vld [vmem:[%s2870_s1] ss:$0 sm:$0xff] (!%p2886_p3)  ;;  %v2391_v3 = vmov (!%p2886_p3), 0   ;;  %v2392_v5 = vmov (!%p2886_p3), 0.0  }
  0x2d   : > { %s2505_s27 = scalar_select %p392_p2, %s2463_s10, 1 }
  0x2e   : > { %420 = sbr.rel (%p2886_p3) target bundleno = 336 (0x150), region = 64  ;;  %v427_v2 = vshrl.u32 (!%p2886_p3), %v426_v0, 7  ;;  %2284 = vset.pattern.permute.xlu1 (!%p2886_p3), %v2391_v3  ;;  %2283 = vset.pattern.permute.xlu0 (!%p2886_p3), %v2391_v3  ;;  %vm555_vm1 = vcmask (!%p2886_p3), 195584   ;;  %vm441_vm3 = vcmask (!%p2886_p3), 588800   ;;  %v447_v11 = vld [vmem:[%s2871_s2 + $0x10] sm:$0xff] (!%p2886_p3)  ;;  %v445_v12 = vld [vmem:[%s2871_s2] sm:$0xff] (!%p2886_p3) }
  0x2f   : > { %s2229_s28 = smul.u32 96, %s2505_s27  ;;  %s399_s12 = scalar_lea.vmem %s2873_s4, %s2505_s27  ;;  %v446_v13 = vld [vmem:[%s2871_s2 + $0x8] sm:$0xff] (!%p2886_p3)  ;;  %v421_v14 = vld [vmem:[#allocation5] sm:$0xff] (!%p2886_p3)  ;;  %vm423_vm4 = vcmask (!%p2886_p3), 261120   ;;  %v2569_v30 = vand.u32 (!%p2886_p3), 127, %v426_v0  ;;  %vm545_vm6 = vcmask (!%p2886_p3), 125952  }
  0x30   : > { %s407_s15 = scalar_lea.vmem %s2875_s6, %s2505_s27  ;;  %s1953_s16 = sshll.u32 %s2505_s27, 5  ;;  %v428_v4 = vadd.s32 (!%p2886_p3), 8, %v427_v2  ;;  %vm434_vm0 = vcmp.eq.s32.totalorder (!%p2886_p3), %v427_v2, %v1892_v1  ;;  %v422_v15 = vld [vmem:[#allocation5 + $0x8] sm:$0xff] (!%p2886_p3)  ;;  %v448_v16 = vld [vmem:[%s2871_s2 + $0x18] sm:$0xff] (!%p2886_p3)  ;;  %424 = vst.msk [vmem:[#allocation8] sm:$0xff] (!%p2886_p3), %vm423_vm4, %v421_v14  ;;  %v451_v39 = vld [vmem:[%s2871_s2 + $0x30] sm:$0xff] (!%p2886_p3) }
  0x31   : > { %s2520_s19 = scalar_lea.vmem %s2872_s3, %s2229_s28  ;;  %s2525_s22 = scalar_lea.vmem %s2874_s5, %s2229_s28  ;;  %v1893_v6 = vsel (!%p2886_p3), %vm434_vm0, 1.0, %v2392_v5  ;;  %425 = vst.msk [vmem:[#allocation8 + $0x8] sm:$0xff] (!%p2886_p3), %vm423_vm4, %v422_v15  ;;  %v449_v17 = vld [vmem:[%s2871_s2 + $0x20] sm:$0xff] (!%p2886_p3)  ;;  %v450_v18 = vld [vmem:[%s2871_s2 + $0x28] sm:$0xff] (!%p2886_p3)  ;;  %v452_v32 = vld [vmem:[%s2871_s2 + $0x38] sm:$0xff] (!%p2886_p3)  ;;  %vm590_vm13 = vcmask (!%p2886_p3), 523520  }
  0x32   : > { %s2530_s25 = scalar_lea.vmem %s2876_s7, %s1953_s16  ;;  %s415_s11 = scalar_lea.vmem %s2877_s8, %s2505_s27  ;;  %vm435_vm2 = vcmp.eq.s32.totalorder (!%p2886_p3), %v428_v4, %v1892_v1  ;;  %v556_v19 = vsel (!%p2886_p3), %vm555_vm1, %v1893_v6, 0.0  ;;  %v453_v35 = vld [vmem:[%s2871_s2 + $0x40] sm:$0xff] (!%p2886_p3)  ;;  %vm611_vm15 = vcmask (!%p2886_p3), 785920  }
  0x33   : > { %v1894_v7 = vsel (!%p2886_p3), %vm435_vm2, 1.0, %v2392_v5  ;;  %s2393_s28 = smov (!%p2886_p3), 104   ;;  %s2394_s16 = smov (!%p2886_p3), 80  }
  0x34   : > { %v2273_v8 = vpack.i.bf16 (!%p2886_p3), %v1894_v7, %v1893_v6  ;;  %v440_v9 = vpack.c.bf16 (!%p2886_p3), %v1894_v7, %v1893_v6  ;;  %v559_v10 = vsel (!%p2886_p3), %vm555_vm1, %v1894_v7, 0.0 }
  0x35   : > { %560 = vadd.xlane.f32.xlu1 %v559_v10 }
  0x36   : > { %2274 = vrot.lane.b32.xlu0 %v2273_v8, %s2393_s28  ;;  %442 = vst.msk [vmem:[#allocation3] sm:$0xff] %vm441_vm3, %v440_v9 }
  0x3a   : > { %2279 = vrot.lane.b32.xlu0 %v2273_v8, %s2394_s16 }
  0x3e   : > { %461 = vperm.xlu0 %2283, %v447_v11  }
  0x46   : > { %455 = vperm.xlu1 %2284, %v445_v12  }
  0x4a   : > { %458 = vperm.xlu1 %2284, %v446_v13  }
  0x4e   : > { %464 = vperm.xlu1 %2284, %v448_v16  }
  0x52   : > { %467 = vperm.xlu1 %2284, %v449_v17  }
  0x56   : > { %470 = vperm.xlu1 %2284, %v450_v18  }
  0x5d   : > { %557 = vadd.xlane.f32.xlu0 %v556_v19 }
  0xa8   : > { %v2275_v20 = vpop.permute.xlu0 %2274 }
  0xa9   : > { %v2276_v21 = vunpack.i.l.bf16 %v2275_v20  ;;  %v2277_v22 = vunpack.i.h.bf16 %v2275_v20 }
  0xab   : > { %v578_v23 = vsel %vm555_vm1, %v2276_v21, 0.0  ;;  %v581_v27 = vsel %vm555_vm1, %v2277_v22, 0.0 }
  0xac   : > { %v2280_v24 = vpop.permute.xlu0 %2279  ;;  %579 = vadd.xlane.f32.xlu0 %v578_v23 }
  0xad   : > { %v2282_v25 = vunpack.i.h.bf16 %v2280_v24  ;;  %v2281_v26 = vunpack.i.l.bf16 %v2280_v24 }
  0xaf   : > { %v599_v28 = vsel %vm555_vm1, %v2281_v26, 0.0  ;;  %v602_v29 = vsel %vm555_vm1, %v2282_v25, 0.0 }
  0xb0   : > { %582 = vadd.xlane.f32.xlu0 %v581_v27  ;;  %600 = vadd.xlane.f32.xlu1 %v599_v28 }
  0xb4   : > { %603 = vadd.xlane.f32.xlu0 %v602_v29 }
  0xbd   : > { %v462_v31 = vpop.permute.xlu0 %461 }
  0xbe   : > { %vm483_vm5 = vcmp.eq.s32.totalorder %v2569_v30, %v462_v31 }
  0xbf   : > { %v1897_v33 = vsel %vm483_vm5, 1.0, %v2392_v5 }
  0xc0   : > { %v1956_v34 = vpack.c.bf16 %v1897_v33, %v1897_v33 }
  0xc1   : > { %476 = vperm.xlu1 %2284, %v452_v32  }
  0xc2   : > { %v561_v36 = vpop.xlane.xlu1 %560  ;;  %548 = vst.msk [vmem:[#allocation2 + $0x8] sm:$0xf] %vm545_vm6, %v1956_v34 }
  0xc3   : > { %v563_v37 = vmax.f32 %v561_v36, 1.0 }
  0xc5   : > { %479 = vperm.xlu1 %2284, %v453_v35   ;;  %2285 = vrcp.f32 %v563_v37 }
  0xc6   : > { %v456_v38 = vpop.permute.xlu1 %455 }
  0xc7   : > { %vm481_vm7 = vcmp.eq.s32.totalorder %v2569_v30, %v456_v38 }
  0xc8   : > { %v1895_v40 = vsel %vm481_vm7, 1.0, %v2392_v5 }
  0xc9   : > { %v1954_v41 = vpack.c.bf16 %v1895_v40, %v1895_v40 }
  0xca   : > { %473 = vperm.xlu0 %2283, %v451_v39   ;;  %v459_v42 = vpop.permute.xlu1 %458 }
  0xcb   : > { %546 = vst.msk [vmem:[#allocation2] sm:$0xf] %vm545_vm6, %v1954_v41  ;;  %vm482_vm8 = vcmp.eq.s32.totalorder %v2569_v30, %v459_v42 }
  0xcc   : > { %v1896_v43 = vsel %vm482_vm8, 1.0, %v2392_v5 }
  0xcd   : > { %v1955_v44 = vpack.c.bf16 %v1896_v43, %v1896_v43 }
  0xce   : > { %v465_v45 = vpop.permute.xlu1 %464 }
  0xcf   : > { %v2286_v46 = vpop.eup %2285  ;;  %547 = vst.msk [vmem:[#allocation2 + $0x4] sm:$0xf] %vm545_vm6, %v1955_v44  ;;  %vm484_vm9 = vcmp.eq.s32.totalorder %v2569_v30, %v465_v45 }
  0xd0   : > { %569 = vst.msk [vmem:[#allocation4 + $0x8] sm:$0xff] %vm423_vm4, %v2286_v46  ;;  %v1898_v47 = vsel %vm484_vm9, 1.0, %v2392_v5 }
  0xd1   : > { %v1957_v48 = vpack.c.bf16 %v1898_v47, %v1898_v47 }
  0xd2   : > { %v468_v49 = vpop.permute.xlu1 %467 }
  0xd3   : > { %549 = vst.msk [vmem:[#allocation2 + $0xc] sm:$0xf] %vm545_vm6, %v1957_v48  ;;  %vm485_vm10 = vcmp.eq.s32.totalorder %v2569_v30, %v468_v49 }
  0xd4   : > { %v1899_v50 = vsel %vm485_vm10, 1.0, %v2392_v5 }
  0xd5   : > { %v1958_v51 = vpack.c.bf16 %v1899_v50, %v1899_v50 }
  0xd6   : > { %v471_v52 = vpop.permute.xlu1 %470 }
  0xd7   : > { %550 = vst.msk [vmem:[#allocation2 + $0x10] sm:$0xf] %vm545_vm6, %v1958_v51  ;;  %vm486_vm11 = vcmp.eq.s32.totalorder %v2569_v30, %v471_v52 }
  0xd8   : > { %v1900_v53 = vsel %vm486_vm11, 1.0, %v2392_v5 }
  0xd9   : > { %v1959_v54 = vpack.c.bf16 %v1900_v53, %v1900_v53 }
  0xdb   : > { %551 = vst.msk [vmem:[#allocation2 + $0x14] sm:$0xf] %vm545_vm6, %v1959_v54 }
  0xea   : > { %v558_v55 = vpop.xlane.xlu0 %557 }
  0xeb   : > { %v562_v56 = vmax.f32 %v558_v55, 1.0 }
  0xed   : > { %2287 = vrcp.f32 %v562_v56 }
  0xf7   : > { %v2288_v57 = vpop.eup %2287 }
  0xf8   : > { %568 = vst.msk [vmem:[#allocation4] sm:$0xff] %vm423_vm4, %v2288_v57 }
 0x139   : > { %v580_v58 = vpop.xlane.xlu0 %579 }
 0x13a   : > { %v584_v59 = vmax.f32 %v580_v58, 1.0 }
 0x13c   : > { %2289 = vrcp.f32 %v584_v59 }
 0x13d   : > { %v583_v60 = vpop.xlane.xlu0 %582  ;;  %v601_v61 = vpop.xlane.xlu1 %600 }
 0x13e   : > { %v585_v62 = vmax.f32 %v583_v60, 1.0  ;;  %v605_v63 = vmax.f32 %v601_v61, 1.0 }
 0x140   : > { %2291 = vrcp.f32 %v585_v62 }
 0x141   : > { %2293 = vrcp.f32 %v605_v63  ;;  %v604_v0 = vpop.xlane.xlu0 %603  ;;  %v477_v1 = vpop.permute.xlu1 %476 }
 0x142   : > { %v606_v2 = vmax.f32 %v604_v0, 1.0  ;;  %vm488_vm12 = vcmp.eq.s32.totalorder %v2569_v30, %v477_v1 }
 0x143   : > { %v1902_v3 = vsel %vm488_vm12, 1.0, %v2392_v5 }
 0x144   : > { %2295 = vrcp.f32 %v606_v2  ;;  %v1961_v4 = vpack.c.bf16 %v1902_v3, %v1902_v3 }
 0x145   : > { %v480_v6 = vpop.permute.xlu1 %479 }
 0x146   : > { %v2290_v7 = vpop.eup %2289  ;;  %553 = vst.msk [vmem:[#allocation2 + $0x1c] sm:$0xf] %vm545_vm6, %v1961_v4  ;;  %vm489_vm14 = vcmp.eq.s32.totalorder %v2569_v30, %v480_v6 }
 0x147   : > { %591 = vst.msk [vmem:[#allocation4] sm:$0xff] %vm590_vm13, %v2290_v7  ;;  %v1903_v8 = vsel %vm489_vm14, 1.0, %v2392_v5 }
 0x148   : > { %v1962_v9 = vpack.c.bf16 %v1903_v8, %v1903_v8 }
 0x149   : > { %v474_v10 = vpop.permute.xlu0 %473 }
 0x14a   : > { %v2292_v11 = vpop.eup %2291  ;;  %554 = vst.msk [vmem:[#allocation2 + $0x20] sm:$0xf] %vm545_vm6, %v1962_v9  ;;  %vm487_vm0 = vcmp.eq.s32.totalorder %v2569_v30, %v474_v10 }
 0x14b   : > { %v2294_v12 = vpop.eup %2293  ;;  %592 = vst.msk [vmem:[#allocation4 + $0x8] sm:$0xff] %vm590_vm13, %v2292_v11  ;;  %v1901_v13 = vsel %vm487_vm0, 1.0, %v2392_v5 }
 0x14c   : > { %612 = vst.msk [vmem:[#allocation4] sm:$0xff] %vm611_vm15, %v2294_v12  ;;  %v1960_v14 = vpack.c.bf16 %v1901_v13, %v1901_v13 }
 0x14e   : > { %v2296_v15 = vpop.eup %2295  ;;  %552 = vst.msk [vmem:[#allocation2 + $0x18] sm:$0xf] %vm545_vm6, %v1960_v14 }
 0x14f   : > { %613 = vst.msk [vmem:[#allocation4 + $0x8] sm:$0xff] %vm611_vm15, %v2296_v15 }
 0x150 PF: > { %v2395_v18 = vmov 0.0   ;;  %vm2396_vm1 = vmmov 0   ;;  %v2299_v5 = vld [vmem:[#allocation2] sm:$0xff]   ;;  %vm649_vm2 = vcmask 130048   ;;  %v2397_v20 = vmov 0.0|0.0   ;;  %v2300_v21 = vld [vmem:[#allocation2 + $0x8] sm:$0xff]  }
 0x151   : > { %2026 = vmatprep.subr.bf16.mxu0 %v2395_v18  ;;  %2028 = vmatprep.mubr.msk.bf16.mxu0 %vm2396_vm1, %v2395_v18  ;;  %v2301_v22 = vld [vmem:[#allocation2 + $0x10] sm:$0xff]   ;;  %v2303_v24 = vld [vmem:[#allocation2 + $0x20] ss:$0 sps:$4 sm:$0xff]   ;;  %v754_v26 = vld [vmem:[%s2525_s22 + $0x28] sm:$0xff]  ;;  %vm761_vm3 = vcmask 261120   ;;  %vm1042_vm4 = vcmask 785408  }
 0x152   : > { %v2611_v16 = vld [vmem:[#allocation8] sm:$0xff]  ;;  %2056 = vmatprep.mubr.msk.f32.mxu1 %vm2396_vm1, %v2395_v18  ;;  %2185 = vmatprep.subr.bf16.mxu1 %v2397_v20  ;;  %v753_v25 = vld [vmem:[%s2525_s22 + $0x20] sm:$0xff]  ;;  %v744_v32 = vld [vmem:[%s2520_s19 + $0x38] sm:$0xff]  ;;  %vm1338_vm5 = vcmask 7168   ;;  %s2400_s29 = smov 96   ;;  %vm1442_vm6 = vcmask 1043456  }
 0x153   : > { %v2613_v17 = vld [vmem:[#allocation8 + $0x8] sm:$0xff]  ;;  %v2204_v27 = vpack.c.bf16 %v754_v26, %v753_v25  ;;  %v741_v28 = vld [vmem:[%s2520_s19 + $0x20] sm:$0xff]  ;;  %v742_v29 = vld [vmem:[%s2520_s19 + $0x28] sm:$0xff]  ;;  %vm1438_vm7 = vcmask 195584   ;;  %s2401_s13 = smov 104   ;;  %s2402_s14 = smov 80  }
 0x154   : > { %v616_v19 = vpack.c.bf16 %v2613_v17, %v2611_v16  ;;  %v2186_v30 = vpack.c.bf16 %v742_v29, %v741_v28  ;;  %v743_v31 = vld [vmem:[%s2520_s19 + $0x30] sm:$0xff]  ;;  %v756_v35 = vld [vmem:[%s2525_s22 + $0x38] sm:$0xff]  ;;  %v737_v41 = vld [vmem:[%s2520_s19] sm:$0xff]  ;;  %s2403_s28 = smov 32   ;;  %s2404_s27 = smov [#allocation8]  }
 0x155   : > { %v2302_v23 = vld [vmem:[#allocation2 + $0x18] sm:$0xff]   ;;  %v755_v33 = vld [vmem:[%s2525_s22 + $0x30] sm:$0xff]  ;;  %v2189_v34 = vpack.c.bf16 %v744_v32, %v743_v31  ;;  %v738_v42 = vld [vmem:[%s2520_s19 + $0x8] sm:$0xff]  ;;  %p2244_p4 = scmp.eq.s32.totalorder %s2463_s10, 1 }
 0x156   : > { %2027 = vmatpush3.bf16.msra.mxu0 %v616_v19  ;;  %2187 = vmatpush3.bf16.msra.mxu1 %v2186_v30  ;;  %v2207_v36 = vpack.c.bf16 %v756_v35, %v755_v33  ;;  %v757_v43 = vld [vmem:[%s2525_s22 + $0x40] sm:$0xff]  ;;  %v758_v44 = vld [vmem:[%s2525_s22 + $0x48] sm:$0xff]  ;;  %v2192_v46 = vpack.c.bf16 %v738_v42, %v737_v41  ;;  %v739_v48 = vld [vmem:[%s2520_s19 + $0x10] sm:$0xff] }
 0x157   : > { %2203 = vmatprep.subr.bf16.mxu0 %v2397_v20  ;;  %2188 = vmatprep.subr.bf16.mxu1 %v2397_v20  ;;  %v740_v49 = vld [vmem:[%s2520_s19 + $0x18] sm:$0xff]  ;;  %v2216_v51 = vpack.c.bf16 %v758_v44, %v757_v43  ;;  %v759_v54 = vld [vmem:[%s2525_s22 + $0x50] sm:$0xff]  ;;  %v745_v61 = vld [vmem:[%s2520_s19 + $0x40] sm:$0xff] }
 0x158   : > { %v2195_v53 = vpack.c.bf16 %v740_v49, %v739_v48  ;;  %v760_v55 = vld [vmem:[%s2525_s22 + $0x58] sm:$0xff]  ;;  %v746_v62 = vld [vmem:[%s2520_s19 + $0x48] sm:$0xff]  ;;  %v747_v0 = vld [vmem:[%s2520_s19 + $0x50] sm:$0xff] }
 0x159   : > { %2029 = vmatmul.mubr.msk.bf16.vlgmr.msra.gmra.mrb[0].mxu0 %vm649_vm2, %v2299_v5  ;;  %v2219_v56 = vpack.c.bf16 %v760_v55, %v759_v54  ;;  %v2198_v63 = vpack.c.bf16 %v746_v62, %v745_v61  ;;  %v748_v1 = vld [vmem:[%s2520_s19 + $0x58] sm:$0xff]  ;;  %v749_v8 = vld [vmem:[%s2525_s22] sm:$0xff]  ;;  %v750_v9 = vld [vmem:[%s2525_s22 + $0x8] sm:$0xff] }
 0x15a   : > { %2032 = vmatprep.mubr.msk.bf16.mxu0 %vm2396_vm1, %v2395_v18  ;;  %2205 = vmatpush3.bf16.msra.mxu0 %v2204_v27  ;;  %v2201_v4 = vpack.c.bf16 %v748_v1, %v747_v0  ;;  %v2210_v12 = vpack.c.bf16 %v750_v9, %v749_v8  ;;  %v751_v15 = vld [vmem:[%s2525_s22 + $0x10] sm:$0xff]  ;;  %v752_v19 = vld [vmem:[%s2525_s22 + $0x18] sm:$0xff]  ;;  %v1932_v49 = vld [vmem:[%s399_s12] ss:$0 sm:$0xff] }
 0x15b   : > { %2206 = vmatprep.subr.bf16.mxu0 %v2397_v20  ;;  %2190 = vmatpush3.bf16.msra.mxu1 %v2189_v34  ;;  %v2213_v5 = vpack.c.bf16 %v752_v19, %v751_v15 }
 0x15c   : > { %2191 = vmatprep.subr.bf16.mxu1 %v2397_v20 }
 0x15e   : > { %2208 = vmatpush3.bf16.msra.mxu0 %v2207_v36 }
 0x15f   : > { %2215 = vmatprep.subr.bf16.mxu0 %v2397_v20 }
 0x161   : > { %2033 = vmatmul.mubr.msk.bf16.gmra.mrb[4].mxu0 %vm649_vm2, %v2300_v21 }
 0x162   : > { %2036 = vmatprep.mubr.msk.bf16.mxu0 %vm2396_vm1, %v2395_v18 }
 0x169   : > { %2037 = vmatmul.mubr.msk.bf16.gmra.mrb[8].mxu0 %vm649_vm2, %v2301_v22 }
 0x16a   : > { %2040 = vmatprep.mubr.msk.bf16.mxu0 %vm2396_vm1, %v2395_v18 }
 0x171   : > { %2041 = vmatmul.mubr.msk.bf16.gmra.mrb[12].mxu0 %vm649_vm2, %v2302_v23 }
 0x172   : > { %2044 = vmatprep.mubr.msk.bf16.mxu0 %vm2396_vm1, %v2395_v18 }
 0x179   : > { %2045 = vmatmul.mubr.msk.bf16.gmra.mrb[16].mxu0 %vm649_vm2, %v2303_v24 }
 0x17a   : > { %2107 = vmatprep.mubr.msk.f32.mxu0 %vm2396_vm1, %v2395_v18 }
 0x22c   : > { %v2651_v37 = vpop.f32.mrb[0].mxu0 }
 0x22d   : > { %v2030_v38 = vpop.f32.mrb[1].mxu0 }
 0x22e   : > { %v2653_v39 = vpop.f32.mrb[2].mxu0 }
 0x22f   : > { %v2031_v40 = vpop.f32.mrb[3].mxu0 }
 0x234   : > { %v2659_v45 = vpop.f32.mrb[4].mxu0 }
 0x235   : > { %v2034_v47 = vpop.f32.mrb[5].mxu0 }
 0x236   : > { %v710_v50 = vpop.f32.mrb[6].mxu0 }
 0x237   : > { %v2035_v52 = vpop.f32.mrb[7].mxu0  ;;  %2057 = vmatmul.mubr.msk.f32.vlgmr.msra.gmra.mrb[0].mxu1 %vm761_vm3, %v710_v50  ;;  %2108 = vmatmul.mubr.msk.f32.vlgmr.msra.gmra.mrb[20].mxu0 %vm761_vm3, %v710_v50 }
 0x238   : > { %2193 = vmatpush3.bf16.msra.mxu1 %v2192_v46  ;;  %2059 = vmatprep.mubr.msk.f32.mxu1 %vm2396_vm1, %v2395_v18 }
 0x239   : > { %2110 = vmatprep.mubr.msk.f32.mxu0 %vm2396_vm1, %v2395_v18  ;;  %2194 = vmatprep.subr.bf16.mxu1 %v2397_v20 }
 0x23a   : > { %2217 = vmatpush3.bf16.msra.mxu0 %v2216_v51 }
 0x23b   : > { %2218 = vmatprep.subr.bf16.mxu0 %v2397_v20 }
 0x23c   : > { %v715_v57 = vpop.f32.mrb[8].mxu0  ;;  %2196 = vmatpush3.bf16.msra.mxu1 %v2195_v53 }
 0x23d   : > { %v2038_v58 = vpop.f32.mrb[9].mxu0  ;;  %2060 = vmatmul.mubr.msk.f32.gmra.mrb[2].mxu1 %vm761_vm3, %v715_v57  ;;  %2111 = vmatmul.mubr.msk.f32.gmra.mrb[22].mxu0 %vm761_vm3, %v715_v57 }
 0x23e   : > { %v718_v59 = vpop.f32.mrb[10].mxu0  ;;  %2062 = vmatprep.mubr.msk.f32.mxu1 %vm2396_vm1, %v2395_v18  ;;  %2113 = vmatprep.mubr.msk.f32.mxu0 %vm2396_vm1, %v2395_v18 }
 0x23f   : > { %v2039_v60 = vpop.f32.mrb[11].mxu0  ;;  %2197 = vmatprep.subr.bf16.mxu1 %v2397_v20  ;;  %2220 = vmatpush3.bf16.msra.mxu0 %v2219_v56 }
 0x240   : > { %2166 = vmatprep.subr.bf16.mxu0 %v2395_v18 }
 0x241   : > { %2063 = vmatmul.mubr.msk.f32.gmra.mrb[4].mxu1 %vm761_vm3, %v718_v59  ;;  %2114 = vmatmul.mubr.msk.f32.gmra.mrb[24].mxu0 %vm761_vm3, %v718_v59 }
 0x242   : > { %2073 = vmatprep.mubr.msk.f32.mxu1 %vm2396_vm1, %v2395_v18  ;;  %2141 = vmatprep.mubr.msk.f32.mxu0 %vm2396_vm1, %v2395_v18 }
 0x244   : > { %v723_v2 = vpop.f32.mrb[12].mxu0 }
 0x245   : > { %2074 = vmatmul.mubr.msk.f32.vlgmr.msra.gmra.mrb[6].mxu1 %vm761_vm3, %v2651_v37  ;;  %2142 = vmatmul.mubr.msk.f32.vlgmr.msra.gmra.mrb[26].mxu0 %vm761_vm3, %v723_v2  ;;  %v2042_v3 = vpop.f32.mrb[13].mxu0 }
 0x246   : > { %2199 = vmatpush3.bf16.msra.mxu1 %v2198_v63  ;;  %2076 = vmatprep.mubr.msk.f32.mxu1 %vm2396_vm1, %v2395_v18  ;;  %v726_v6 = vpop.f32.mrb[14].mxu0 }
 0x247   : > { %2200 = vmatprep.subr.bf16.mxu1 %v2397_v20  ;;  %2144 = vmatprep.mubr.msk.f32.mxu0 %vm2396_vm1, %v2395_v18  ;;  %v2043_v7 = vpop.f32.mrb[15].mxu0 }
 0x249   : > { %2077 = vmatmul.mubr.msk.f32.gmra.mrb[8].mxu1 %vm761_vm3, %v2653_v39  ;;  %2145 = vmatmul.mubr.msk.f32.gmra.mrb[28].mxu0 %vm761_vm3, %v726_v6 }
 0x24a   : > { %2079 = vmatprep.mubr.msk.f32.mxu1 %vm2396_vm1, %v2395_v18  ;;  %2202 = vmatpush3.bf16.msra.mxu1 %v2201_v4 }
 0x24b   : > { %2209 = vmatprep.subr.bf16.mxu1 %v2397_v20  ;;  %2147 = vmatprep.mubr.msk.f32.mxu0 %vm2396_vm1, %v2395_v18 }
 0x24c   : > { %v731_v10 = vpop.f32.mrb[16].mxu0 }
 0x24d   : > { %2080 = vmatmul.mubr.msk.f32.gmra.mrb[10].mxu1 %vm761_vm3, %v2659_v45  ;;  %v2046_v11 = vpop.f32.mrb[17].mxu0  ;;  %2148 = vmatmul.mubr.msk.f32.gmra.mrb[30].mxu0 %vm761_vm3, %v731_v10 }
 0x24e   : > { %2090 = vmatprep.mubr.msk.f32.mxu1 %vm2396_vm1, %v2395_v18  ;;  %v734_v13 = vpop.f32.mrb[18].mxu0  ;;  %2170 = vmatprep.mubr.msk.bf16.mxu0 %vm2396_vm1, %v2395_v18 }
 0x24f   : > { %v2047_v14 = vpop.f32.mrb[19].mxu0 }
 0x251   : > { %2091 = vmatmul.mubr.msk.f32.vlgmr.msra.gmra.mrb[12].mxu1 %vm761_vm3, %v723_v2 }
 0x252   : > { %2211 = vmatpush3.bf16.msra.mxu1 %v2210_v12  ;;  %2093 = vmatprep.mubr.msk.f32.mxu1 %vm2396_vm1, %v2395_v18  ;;  %v1942_v12 = vld [vmem:[%s407_s15] ss:$0 sm:$0xff]  ;;  %s2399_s15 = smov 64  }
 0x253   : > { %2212 = vmatprep.subr.bf16.mxu1 %v2397_v20  ;;  %v2398_v20 = vmov 0  }
 0x254   : > { %2298 = vset.pattern.permute.xlu1 %v2398_v20  ;;  %2297 = vset.pattern.permute.xlu0 %v2398_v20 }
 0x255   : > { %2094 = vmatmul.mubr.msk.f32.gmra.mrb[14].mxu1 %vm761_vm3, %v726_v6 }
 0x256   : > { %2096 = vmatprep.mubr.msk.f32.mxu1 %vm2396_vm1, %v2395_v18  ;;  %2214 = vmatpush3.bf16.msra.mxu1 %v2213_v5 }
 0x257   : > { %2150 = vmatprep.subr.bf16.mxu1 %v2395_v18 }
 0x259   : > { %2097 = vmatmul.mubr.msk.f32.gmra.mrb[16].mxu1 %vm761_vm3, %v731_v10 }
 0x25a   : > { %2124 = vmatprep.mubr.msk.f32.mxu1 %vm2396_vm1, %v2395_v18 }
 0x25d   : > { %2125 = vmatmul.mubr.msk.f32.vlgmr.msra.gmra.mrb[18].mxu1 %vm761_vm3, %v2651_v37 }
 0x25e   : > { %2127 = vmatprep.mubr.msk.f32.mxu1 %vm2396_vm1, %v2395_v18 }
 0x261   : > { %2128 = vmatmul.mubr.msk.f32.gmra.mrb[20].mxu1 %vm761_vm3, %v2653_v39 }
 0x262   : > { %2130 = vmatprep.mubr.msk.f32.mxu1 %vm2396_vm1, %v2395_v18 }
 0x265   : > { %2131 = vmatmul.mubr.msk.f32.gmra.mrb[22].mxu1 %vm761_vm3, %v2659_v45 }
 0x266   : > { %2154 = vmatprep.mubr.msk.bf16.mxu1 %vm2396_vm1, %v2395_v18 }
 0x30a   : > { %v837_v21 = vpop.f32.mrb[0].mxu1  ;;  %v1151_v22 = vpop.f32.mrb[20].mxu0 }
 0x30b   : > { %v2058_v23 = vpop.f32.mrb[1].mxu1  ;;  %v2109_v24 = vpop.f32.mrb[21].mxu0 }
 0x310   : > { %v842_v25 = vpop.f32.mrb[2].mxu1  ;;  %v1156_v26 = vpop.f32.mrb[22].mxu0 }
 0x311   : > { %v2061_v27 = vpop.f32.mrb[3].mxu1  ;;  %v2112_v28 = vpop.f32.mrb[23].mxu0 }
 0x314   : > { %v847_v29 = vpop.f32.mrb[4].mxu1  ;;  %v2741_v30 = vpop.f32.mrb[24].mxu0 }
 0x315   : > { %v2064_v31 = vpop.f32.mrb[5].mxu1  ;;  %v2115_v32 = vpop.f32.mrb[25].mxu0 }
 0x318   : > { %v926_v33 = vpop.f32.mrb[6].mxu1  ;;  %v1311_v34 = vpop.f32.mrb[26].mxu0 }
 0x319   : > { %v927_v35 = vadd.f32 %v926_v33, %v837_v21  ;;  %v2075_v36 = vpop.f32.mrb[7].mxu1  ;;  %v2143_v37 = vpop.f32.mrb[27].mxu0 }
 0x31c   : > { %v931_v38 = vpop.f32.mrb[8].mxu1  ;;  %v1316_v39 = vpop.f32.mrb[28].mxu0 }
 0x31d   : > { %v932_v40 = vadd.f32 %v931_v38, %v842_v25  ;;  %v2078_v41 = vpop.f32.mrb[9].mxu1  ;;  %v2146_v42 = vpop.f32.mrb[29].mxu0 }
 0x320   : > { %v936_v43 = vpop.f32.mrb[10].mxu1  ;;  %v1321_v44 = vpop.f32.mrb[30].mxu0 }
 0x321   : > { %v937_v45 = vadd.f32 %v936_v43, %v847_v29  ;;  %v2081_v46 = vpop.f32.mrb[11].mxu1  ;;  %v2149_v47 = vpop.f32.mrb[31].mxu0 }
 0x324   : > { %v1015_v48 = vpop.f32.mrb[12].mxu1 }
 0x325   : > { %v1029_v50 = vadd.f32 %v1015_v48, %v927_v35  ;;  %v2092_v51 = vpop.f32.mrb[13].mxu1 }
 0x327   : > { %v2748_v52 = vadd.f32 %v1932_v49, %v1029_v50 }
 0x328   : > { %v1020_v53 = vpop.f32.mrb[14].mxu1 }
 0x329   : > { %v1030_v54 = vadd.f32 %v1020_v53, %v932_v40  ;;  %v2095_v55 = vpop.f32.mrb[15].mxu1  ;;  %v1056_v56 = vmul.f32 %v2748_v52, %v2748_v52  ;;  %v1043_v59 = vsel %vm1042_vm4, %v2748_v52, 0.0 }
 0x32b   : > { %v2752_v57 = vadd.f32 %v1932_v49, %v1030_v54  ;;  %v1059_v1 = vsel %vm1042_vm4, %v1056_v56, 0.0 }
 0x32c   : > { %v1025_v58 = vpop.f32.mrb[16].mxu1 }
 0x32d   : > { %v1044_v60 = vsel %vm1042_vm4, %v2752_v57, 0.0  ;;  %v1057_v61 = vmul.f32 %v2752_v57, %v2752_v57  ;;  %v1031_v62 = vadd.f32 %v1025_v58, %v937_v45  ;;  %v2098_v63 = vpop.f32.mrb[17].mxu1 }
 0x32e   : > { %v1045_v0 = vadd.f32 %v1044_v60, %v1043_v59 }
 0x32f   : > { %v1060_v2 = vsel %vm1042_vm4, %v1057_v61, 0.0  ;;  %v2762_v3 = vadd.f32 %v1932_v49, %v1031_v62 }
 0x330   : > { %v1061_v4 = vadd.f32 %v1060_v2, %v1059_v1  ;;  %v1231_v6 = vpop.f32.mrb[18].mxu1 }
 0x331   : > { %v1046_v7 = vsel %vm1042_vm4, %v2762_v3, 0.0  ;;  %v1058_v8 = vmul.f32 %v2762_v3, %v2762_v3  ;;  %v1232_v9 = vadd.f32 %v1231_v6, %v1151_v22  ;;  %v2126_v10 = vpop.f32.mrb[19].mxu1 }
 0x332   : > { %v1047_v11 = vadd.f32 %v1046_v7, %v1045_v0 }
 0x333   : > { %v1062_v13 = vsel %vm1042_vm4, %v1058_v8, 0.0  ;;  %v1325_v14 = vadd.f32 %v1311_v34, %v1232_v9 }
 0x334   : > { %v1048_v15 = vrot.slane %v1047_v11, 4  ;;  %v1063_v19 = vadd.f32 %v1062_v13, %v1061_v4  ;;  %v1236_v5 = vpop.f32.mrb[20].mxu1 }
 0x335   : > { %v2774_v20 = vadd.f32 %v1942_v12, %v1325_v14  ;;  %v1237_v21 = vadd.f32 %v1236_v5, %v1156_v26  ;;  %v2129_v23 = vpop.f32.mrb[21].mxu1 }
 0x336   : > { %v1049_v24 = vadd.f32 %v1048_v15, %v1047_v11  ;;  %v1064_v25 = vrot.slane %v1063_v19, 4 }
 0x337   : > { %v1326_v22 = vadd.f32 %v1316_v39, %v1237_v21  ;;  %v1351_v31 = vmul.f32 %v2774_v20, %v2774_v20  ;;  %v1339_v26 = vsel %vm1338_vm5, %v2774_v20, 0.0 }
 0x338   : > { %v1050_v27 = vrot.slane %v1049_v24, 2  ;;  %v1065_v28 = vadd.f32 %v1064_v25, %v1063_v19  ;;  %v1241_v29 = vpop.f32.mrb[22].mxu1 }
 0x339   : > { %v2778_v32 = vadd.f32 %v1942_v12, %v1326_v22  ;;  %v1242_v33 = vadd.f32 %v1241_v29, %v2741_v30  ;;  %v2132_v34 = vpop.f32.mrb[23].mxu1  ;;  %v1354_v43 = vsel %vm1338_vm5, %v1351_v31, 0.0 }
 0x33a   : > { %v1051_v35 = vadd.f32 %v1050_v27, %v1049_v24  ;;  %v1066_v36 = vrot.slane %v1065_v28, 2 }
 0x33b   : > { %v1340_v37 = vsel %vm1338_vm5, %v2778_v32, 0.0  ;;  %v1352_v38 = vmul.f32 %v2778_v32, %v2778_v32  ;;  %v1327_v39 = vadd.f32 %v1321_v44, %v1242_v33 }
 0x33c   : > { %v1052_v40 = vrot.slane %v1051_v35, 1  ;;  %v1067_v41 = vadd.f32 %v1066_v36, %v1065_v28  ;;  %v1341_v42 = vadd.f32 %v1340_v37, %v1339_v26 }
 0x33d   : > { %v1355_v30 = vsel %vm1338_vm5, %v1352_v38, 0.0  ;;  %v1337_v45 = vadd.f32 %v1942_v12, %v1327_v39 }
 0x33e   : > { %v1068_v46 = vrot.slane %v1067_v41, 1  ;;  %v1356_v47 = vadd.f32 %v1355_v30, %v1354_v43  ;;  %v1053_v48 = vadd.f32 %v1052_v40, %v1051_v35 }
 0x33f   : > { %v1342_v49 = vsel %vm1338_vm5, %v1337_v45, 0.0  ;;  %v1353_v50 = vmul.f32 %v1337_v45, %v1337_v45 }
 0x340   : > { %v1069_v51 = vadd.f32 %v1068_v46, %v1067_v41  ;;  %v1343_v53 = vadd.f32 %v1342_v49, %v1341_v42  ;;  %v1055_v54 = vmul.f32 0.041666668, %v1053_v48 }
 0x341   : > { %v1357_v55 = vsel %vm1338_vm5, %v1353_v50, 0.0 }
 0x342   : > { %v1070_v44 = vmul.f32 0.041666668, %v1069_v51  ;;  %v1344_v56 = vrot.slane %v1343_v53, 4  ;;  %v1358_v58 = vadd.f32 %v1357_v55, %v1356_v47  ;;  %v1071_v59 = vmul.f32 %v1055_v54, %v1055_v54 }
 0x343   : > { %v1076_v60 = vsub.f32 %v2762_v3, %v1055_v54  ;;  %v1074_v61 = vsub.f32 %v2748_v52, %v1055_v54  ;;  %v1075_v62 = vsub.f32 %v2752_v57, %v1055_v54 }
 0x344   : > { %v1345_v63 = vadd.f32 %v1344_v56, %v1343_v53  ;;  %v1359_v0 = vrot.slane %v1358_v58, 4  ;;  %v1072_v1 = vsub.f32 %v1070_v44, %v1071_v59 }
 0x346   : > { %v1346_v2 = vrot.slane %v1345_v63, 2  ;;  %v1360_v4 = vadd.f32 %v1359_v0, %v1358_v58  ;;  %v1073_v6 = vmax.f32 %v1072_v1, 0.0 }
 0x348   : > { %v1347_v7 = vadd.f32 %v1346_v2, %v1345_v63  ;;  %v1361_v8 = vrot.slane %v1360_v4, 2  ;;  %v1077_v9 = vadd.f32 1e-05, %v1073_v6 }
 0x34a   : > { %v1348_v10 = vrot.slane %v1347_v7, 1  ;;  %v1362_v11 = vadd.f32 %v1361_v8, %v1360_v4  ;;  %2304 = vrsqrt.f32 %v1077_v9 }
 0x34c   : > { %v1349_v12 = vadd.f32 %v1348_v10, %v1347_v7  ;;  %v1363_v13 = vrot.slane %v1362_v11, 1 }
 0x34e   : > { %v1350_v14 = vmul.f32 0.041666668, %v1349_v12  ;;  %v1364_v3 = vadd.f32 %v1363_v13, %v1362_v11 }
 0x350   : > { %v1365_v15 = vmul.f32 0.041666668, %v1364_v3  ;;  %v1366_v52 = vmul.f32 %v1350_v14, %v1350_v14  ;;  %v1369_v57 = vsub.f32 %v2774_v20, %v1350_v14  ;;  %v1370_v19 = vsub.f32 %v2778_v32, %v1350_v14 }
 0x351   : > { %v1371_v5 = vsub.f32 %v1337_v45, %v1350_v14 }
 0x352   : > { %v1367_v21 = vsub.f32 %v1365_v15, %v1366_v52 }
 0x354   : > { %v2305_v23 = vpop.eup %2304  ;;  %v1368_v24 = vmax.f32 %v1367_v21, 0.0  ;;  %v1437_v21 = vld [vmem:[#allocation3] sm:$0xff] }
 0x355   : > { %v1081_v25 = vmul.f32 %v2305_v23, %v1076_v60  ;;  %v1079_v22 = vmul.f32 %v2305_v23, %v1074_v61  ;;  %v1080_v27 = vmul.f32 %v2305_v23, %v1075_v62 }
 0x356   : > { %v1372_v28 = vadd.f32 1e-05, %v1368_v24 }
 0x357   : > { %v1084_v11 = vmax.f32 %v1081_v25, 0.0  ;;  %v1082_v12 = vmax.f32 %v1079_v22, 0.0  ;;  %v1083_v13 = vmax.f32 %v1080_v27, 0.0 }
 0x358   : > { %2306 = vrsqrt.f32 %v1372_v28 }
 0x362   : > { %v2307_v29 = vpop.eup %2306 }
 0x363   : > { %v1374_v31 = vmul.f32 %v2307_v29, %v1369_v57  ;;  %v1375_v33 = vmul.f32 %v2307_v29, %v1370_v19  ;;  %v1376_v34 = vmul.f32 %v2307_v29, %v1371_v5 }
 0x365   : > { %v1377_v35 = vmax.f32 %v1374_v31, 0.0  ;;  %v1378_v36 = vmax.f32 %v1375_v33, 0.0  ;;  %v1379_v26 = vmax.f32 %v1376_v34, 0.0 }
 0x367   : > { %v1380_v20 = vsel %vm1338_vm5, %v1377_v35, -inf  ;;  %v1381_v32 = vsel %vm1338_vm5, %v1378_v36, -inf  ;;  %v1382_v38 = vsel %vm1338_vm5, %v1379_v26, -inf }
 0x368   : > { %v1383_v37 = vmax.f32 %v1380_v20, %v1381_v32 }
 0x36a   : > { %v1384_v39 = vmax.f32 %v1383_v37, %v1382_v38 }
 0x36c   : > { %v1385_v40 = vrot.slane %v1384_v39, 4 }
 0x36e   : > { %v1386_v41 = vmax.f32 %v1384_v39, %v1385_v40 }
 0x370   : > { %v1387_v42 = vrot.slane %v1386_v41, 2 }
 0x372   : > { %v1388_v43 = vmax.f32 %v1386_v41, %v1387_v42  ;;  %v1640_v41 = vld [vmem:[%s2530_s25] sm:$0xff]  ;;  %v1641_v42 = vld [vmem:[%s2530_s25 + $0x8] sm:$0xff] }
 0x374   : > { %v1389_v30 = vrot.slane %v1388_v43, 1 }
 0x376   : > { %v1390_v45 = vmax.f32 %v1388_v43, %v1389_v30  ;;  %v2221_v43 = vpack.c.bf16 %v1641_v42, %v1640_v41  ;;  %v1642_v30 = vld [vmem:[%s2530_s25 + $0x10] sm:$0xff] }
 0x378   : > { %v1391_v46 = vsub.f32 %v1377_v35, %v1390_v45  ;;  %v1392_v47 = vsub.f32 %v1378_v36, %v1390_v45  ;;  %v1393_v48 = vsub.f32 %v1379_v26, %v1390_v45  ;;  %v1643_v45 = vld [vmem:[%s2530_s25 + $0x18] sm:$0xff] }
 0x37a   : > { %v1394_v49 = vmul.f32 1.442695, %v1391_v46  ;;  %v1396_v50 = vmul.f32 1.442695, %v1392_v47  ;;  %v1398_v51 = vmul.f32 1.442695, %v1393_v48  ;;  %v2225_v46 = vpack.c.bf16 %v1643_v45, %v1642_v30 }
 0x37b   : > { %v1435_v47 = vld [vmem:[#allocation4] sm:$0xff] }
 0x37c   : > { %2308 = vpow2.f32 %v1394_v49 }
 0x37d   : > { %2310 = vpow2.f32 %v1396_v50  ;;  %v1436_v50 = vld [vmem:[#allocation4 + $0x8] sm:$0xff] }
 0x37e   : > { %2312 = vpow2.f32 %v1398_v51 }
 0x386   : > { %v2309_v53 = vpop.eup %2308 }
 0x387   : > { %v2311_v54 = vpop.eup %2310  ;;  %v1400_v55 = vsel %vm1338_vm5, %v2309_v53, 0.0 }
 0x388   : > { %v2313_v44 = vpop.eup %2312  ;;  %v1401_v56 = vsel %vm1338_vm5, %v2311_v54, 0.0 }
 0x389   : > { %v1402_v58 = vadd.f32 %v1401_v56, %v1400_v55  ;;  %v1403_v59 = vsel %vm1338_vm5, %v2313_v44, 0.0 }
 0x38b   : > { %v1404_v60 = vadd.f32 %v1403_v59, %v1402_v58 }
 0x38d   : > { %v1405_v61 = vrot.slane %v1404_v60, 4 }
 0x38f   : > { %v1406_v62 = vadd.f32 %v1405_v61, %v1404_v60 }
 0x391   : > { %v1407_v63 = vrot.slane %v1406_v62, 2 }
 0x393   : > { %v1408_v0 = vadd.f32 %v1407_v63, %v1406_v62 }
 0x395   : > { %v1409_v1 = vrot.slane %v1408_v0, 1 }
 0x397   : > { %v1410_v2 = vadd.f32 %v1409_v1, %v1408_v0 }
 0x399   : > { %2314 = vrcp.f32 %v1410_v2 }
 0x3a3   : > { %v2315_v4 = vpop.eup %2314 }
 0x3a4   : > { %v1414_v6 = vmul.f32 %v2315_v4, %v2313_v44  ;;  %v1412_v7 = vmul.f32 %v2315_v4, %v2309_v53  ;;  %v1413_v8 = vmul.f32 %v2315_v4, %v2311_v54 }
 0x3a6   : > { %1427 = vperm.xlu1 %2298, %v1414_v6   ;;  %1417 = vperm.xlu0 %2297, %v1412_v7   ;;  %v1946_v6 = vld [vmem:[%s415_s11] ss:$0 sm:$0xff]  ;;  %s1776_s11 = sshll.u32 %s2404_s27, 4  ;;  %s1777_s11 = int_to_ptr.vmem [resolvable:$true] %s1776_s11 }
 0x3a7   : > { %s2346_s17 = scalar_lea.vmem %s1777_s11, 256  ;;  %p2353_p12 = scmp.lt.s32.totalorder %s1777_s11, %s1777_s11 }
 0x3a8   : > { %p2347_p6 = scmp.ne.s32.totalorder %s1777_s11, %s2346_s17  ;;  %p2354_p13 = scmp.lt.s32.totalorder %s2346_s17, %s2346_s17 }
 0x3aa   : > { %1422 = vperm.xlu0 %2297, %v1413_v8   ;;  %p2348_p10 = pnand %p2347_p6, %p2244_p4  ;;  %p2355_p0 = por %p2354_p13, %p2353_p12 }
 0x3ac   : > { %p2349_p11 = pneg %p2348_p10 }
 0x3ae   : > { %p2356_p1 = pnand %p2355_p0, %p2349_p11 }
 0x425   : > { %v1418_v9 = vpop.permute.xlu0 %1417  ;;  %v1428_v10 = vpop.permute.xlu1 %1427 }
 0x426   : > { %v1432_v3 = vmul.f32 %v1428_v10, %v1084_v11  ;;  %v1430_v15 = vmul.f32 %v1418_v9, %v1082_v12 }
 0x428   : > { %v1434_v19 = vpack.c.bf16 %v1432_v3, %v1432_v3 }
 0x429   : > { %v1423_v14 = vpop.permute.xlu0 %1422 }
 0x42a   : > { %v1431_v52 = vmul.f32 %v1423_v14, %v1083_v13  ;;  %v1444_v5 = vsel %vm1442_vm6, %v1434_v19, 0 }
 0x42c   : > { %v1433_v57 = vpack.c.bf16 %v1431_v52, %v1430_v15 }
 0x42e   : > { %1568 = vrot.lane.b32.xlu0 %v1433_v57, %s2399_s15  ;;  %1494 = vrot.lane.b32.xlu1 %v1433_v57, %s2400_s29 }
 0x42f   : > { %2151 = vmatpush3.bf16.msra.mxu1 %v1433_v57 }
 0x430   : > { %2152 = vmatprep.subr.bf16.mxu1 %v2395_v18 }
 0x432   : > { %1570 = vrot.lane.b32.xlu0 %v1434_v19, %s2399_s15  ;;  %1496 = vrot.lane.b32.xlu1 %v1434_v19, %s2400_s29 }
 0x433   : > { %2153 = vmatpush3.bf16.msra.mxu1 %v1444_v5 }
 0x434   : > { %2158 = vmatprep.subr.bf16.mxu1 %v2395_v18 }
 0x436   : > { %1490 = vrot.lane.b32.xlu1 %v1437_v21, %s2401_s13  ;;  %1566 = vrot.lane.b32.xlu0 %v1437_v21, %s2402_s14 }
 0x437   : > { %2155 = vmatmul.mubr.msk.bf16.vlgmr.msra.gmra.mrb[24].mxu1 %vm1438_vm7, %v1437_v21 }
 0x438   : > { %2162 = vmatprep.mubr.msk.bf16.mxu1 %vm2396_vm1, %v2395_v18 }
 0x4a0   : > { %v1569_v23 = vpop.permute.xlu0 %1568  ;;  %v1495_v24 = vpop.permute.xlu1 %1494 }
 0x4a1   : > { %2159 = vmatpush3.bf16.msra.mxu1 %v1495_v24  ;;  %2167 = vmatpush3.bf16.msra.mxu0 %v1569_v23 }
 0x4a2   : > { %2160 = vmatprep.subr.bf16.mxu1 %v2395_v18  ;;  %2168 = vmatprep.subr.bf16.mxu0 %v2395_v18 }
 0x4a4   : > { %v1571_v25 = vpop.permute.xlu0 %1570  ;;  %v1497_v22 = vpop.permute.xlu1 %1496 }
 0x4a5   : > { %v1577_v27 = vsel %vm1442_vm6, %v1571_v25, 0  ;;  %v1503_v28 = vsel %vm1442_vm6, %v1497_v22, 0 }
 0x4a6   : > { %2161 = vmatpush3.bf16.msra.mxu1 %v1503_v28  ;;  %2169 = vmatpush3.bf16.msra.mxu0 %v1577_v27 }
 0x4a7   : > { %2222 = vmatprep.subr.bf16.mxu1 %v2221_v43 }
 0x4a8   : > { %v1491_v29 = vpop.permute.xlu1 %1490  ;;  %v1567_v31 = vpop.permute.xlu0 %1566 }
 0x4a9   : > { %2163 = vmatmul.mubr.msk.bf16.vlgmr.msra.gmra.mrb[28].mxu1 %vm1438_vm7, %v1491_v29  ;;  %2171 = vmatmul.mubr.msk.bf16.vlgmr.msra.gmra.mrb[32].mxu0 %vm1438_vm7, %v1567_v31 }
 0x4aa   : > { %2224 = vmatpush3.bf16.msra.mxu1 %v2221_v43 }
 0x4ab   : > { %2226 = vmatprep.subr.bf16.mxu1 %v2225_v46 }
 0x4ae   : > { %2228 = vmatpush3.bf16.msra.mxu1 %v2225_v46 }
 0x50a   : > { %v1480_v33 = vpop.f32.mrb[24].mxu1 }
 0x50b   : > { %v2156_v34 = vpop.f32.mrb[25].mxu1  ;;  %v1487_v59 = vmul.f32 %v1480_v33, %v1435_v47 }
 0x50c   : > { %v1483_v35 = vpop.f32.mrb[26].mxu1 }
 0x50d   : > { %v2157_v18 = vpop.f32.mrb[27].mxu1  ;;  %v1488_v61 = vmul.f32 %v1483_v35, %v1436_v50 }
 0x57c   : > { %v1539_v36 = vpop.f32.mrb[28].mxu1  ;;  %v1613_v26 = vpop.f32.mrb[32].mxu0 }
 0x57d   : > { %1548 = vrot.lane.b32.xlu1 %v1539_v36, %s2403_s28  ;;  %v2164_v20 = vpop.f32.mrb[29].mxu1  ;;  %v2172_v32 = vpop.f32.mrb[33].mxu0 }
 0x57e   : > { %v1542_v37 = vpop.f32.mrb[30].mxu1  ;;  %v1616_v38 = vpop.f32.mrb[34].mxu0 }
 0x57f   : > { %1550 = vrot.lane.b32.xlu0 %v1542_v37, %s2403_s28  ;;  %v2165_v39 = vpop.f32.mrb[31].mxu1  ;;  %v2173_v40 = vpop.f32.mrb[35].mxu0 }
 0x581   : > { %1622 = vrot.lane.b32.xlu1 %v1613_v26, %s2399_s15 }
 0x583   : > { %1624 = vrot.lane.b32.xlu0 %v1616_v38, %s2399_s15 }
 0x5ef   : > { %v1549_v48 = vpop.permute.xlu1 %1548 }
 0x5f0   : > { %v1554_v49 = vmul.f32 %v1549_v48, %v1435_v47 }
 0x5f1   : > { %v1551_v51 = vpop.permute.xlu0 %1550 }
 0x5f2   : > { %v1555_v53 = vmul.f32 %v1551_v51, %v1436_v50  ;;  %1558 = vrot.lane.b32.xlu1 %v1554_v49, %s2400_s29 }
 0x5f3   : > { %v1623_v54 = vpop.permute.xlu1 %1622 }
 0x5f4   : > { %v1628_v55 = vmul.f32 %v1623_v54, %v1435_v47  ;;  %1560 = vrot.lane.b32.xlu0 %v1555_v53, %s2400_s29 }
 0x5f5   : > { %v1625_v44 = vpop.permute.xlu0 %1624 }
 0x5f6   : > { %v1629_v56 = vmul.f32 %v1625_v44, %v1436_v50  ;;  %1632 = vrot.lane.b32.xlu1 %v1628_v55, %s2399_s15 }
 0x5f8   : > { %1634 = vrot.lane.b32.xlu0 %v1629_v56, %s2399_s15 }
 0x664   : > { %v1559_v58 = vpop.permute.xlu1 %1558 }
 0x665   : > { %v1564_v62 = vadd.f32 %v1559_v58, %v1487_v59 }
 0x666   : > { %v1561_v60 = vpop.permute.xlu0 %1560 }
 0x667   : > { %v1565_v0 = vadd.f32 %v1561_v60, %v1488_v61 }
 0x668   : > { %v1633_v63 = vpop.permute.xlu1 %1632 }
 0x669   : > { %v1638_v1 = vadd.f32 %v1633_v63, %v1564_v62 }
 0x66a   : > { %v1635_v2 = vpop.permute.xlu0 %1634 }
 0x66b   : > { %v1639_v4 = vadd.f32 %v1635_v2, %v1565_v0  ;;  %2182 = vmatprep.mubr.msk.f32.mxu1 %vm761_vm3, %v1638_v1 }
 0x66d   : > { %2183 = vmatmul.mubr.msk.f32.vlgmr.msra.gmra.mrb[32].mxu1 %vm761_vm3, %v1639_v4 }
 0x740   : > { %v2184_v7 = vpop.f32.mrb[32].mxu1 }
 0x741   : > { %v1729_v8 = vadd.f32 %v2184_v7, %v1946_v6  ;;  %v1723_v9 = vpop.f32.mrb[33].mxu1 }
 0x742   : > { %v1724_v10 = vadd.f32 %v1946_v6, %v1723_v9 }
 0x743   : > { %v1733_v11 = vsel %vm761_vm3, %v1729_v8, 0.0  ;;  %v1744_v12 = vmul.f32 %v1729_v8, %v1729_v8 }
 0x744   : > { %v1732_v13 = vsel %vm761_vm3, %v1724_v10, 0.0  ;;  %v1743_v14 = vmul.f32 %v1724_v10, %v1724_v10 }
 0x745   : > { %v1746_v3 = vsel %vm761_vm3, %v1744_v12, 0.0  ;;  %v1734_v15 = vadd.f32 %v1733_v11, %v1732_v13 }
 0x746   : > { %v1745_v52 = vsel %vm761_vm3, %v1743_v14, 0.0 }
 0x747   : > { %v1735_v57 = vrot.slane %v1734_v15, 4  ;;  %v1747_v19 = vadd.f32 %v1746_v3, %v1745_v52 }
 0x749   : > { %v1736_v5 = vadd.f32 %v1735_v57, %v1734_v15  ;;  %v1748_v21 = vrot.slane %v1747_v19, 4 }
 0x74b   : > { %v1737_v23 = vrot.slane %v1736_v5, 2  ;;  %v1749_v24 = vadd.f32 %v1748_v21, %v1747_v19 }
 0x74d   : > { %v1738_v25 = vadd.f32 %v1737_v23, %v1736_v5  ;;  %v1750_v22 = vrot.slane %v1749_v24, 2 }
 0x74f   : > { %v1739_v27 = vrot.slane %v1738_v25, 1  ;;  %v1751_v28 = vadd.f32 %v1750_v22, %v1749_v24 }
 0x751   : > { %v1740_v29 = vadd.f32 %v1739_v27, %v1738_v25  ;;  %v1752_v31 = vrot.slane %v1751_v28, 1 }
 0x753   : > { %v1742_v33 = vmul.f32 0.0625, %v1740_v29  ;;  %v1753_v34 = vadd.f32 %v1752_v31, %v1751_v28 }
 0x755   : > { %v1754_v35 = vmul.f32 0.0625, %v1753_v34  ;;  %v1755_v18 = vmul.f32 %v1742_v33, %v1742_v33  ;;  %v1758_v36 = vsub.f32 %v1724_v10, %v1742_v33  ;;  %v1759_v26 = vsub.f32 %v1729_v8, %v1742_v33 }
 0x757   : > { %v1756_v20 = vsub.f32 %v1754_v35, %v1755_v18 }
 0x759   : > { %v1757_v32 = vmax.f32 %v1756_v20, 0.0 }
 0x75b   : > { %v1760_v37 = vadd.f32 1e-05, %v1757_v32 }
 0x75d   : > { %2316 = vrsqrt.f32 %v1760_v37 }
 0x767   : > { %v2317_v38 = vpop.eup %2316 }
 0x768   : > { %v1762_v39 = vmul.f32 %v2317_v38, %v1758_v36  ;;  %v1763_v40 = vmul.f32 %v2317_v38, %v1759_v26 }
 0x76a   : > { %v1764_v41 = vmax.f32 %v1762_v39, 0.0  ;;  %v1765_v42 = vmax.f32 %v1763_v40, 0.0 }
 0x76c   : > { %v1766_v43 = vadd.f32 %v1764_v41, %v2611_v16  ;;  %v1767_v30 = vadd.f32 %v1765_v42, %v2613_v17 }
 0x76e   : > { %1768 = vst.msk [vmem:[#allocation8] sm:$0xff] %vm761_vm3, %v1766_v43  ;;  %1769 = vst.msk [vmem:[#allocation8 + $0x8] sm:$0xff] %vm761_vm3, %v1767_v30 }
 0x76f   : > { %2359 = shalt.err (!%p2356_p1)
}
 0x770   : > { %s2360_s21 = scalar_lea.hbm %s2878_s9, 256 }
 0x771   : > { %p2361_p5 = scmp.ne.s32.totalorder %s2878_s9, %s2360_s21  ;;  %p2366_p8 = scmp.lt.u32.totalorder %s2360_s21, %s2878_s9 }
 0x773   : > { %p2362_p7 = pnand %p2361_p5, %p2244_p4 }
 0x775   : > { %p2363_p9 = pneg %p2362_p7 }
 0x777   : > { %p2368_p2 = pnand %p2366_p8, %p2363_p9 }
 0x779   : > { %2371 = shalt.err (!%p2368_p2)
}
 0x77a   : > { %s2405_s12 = smov 128   ;;  %s2406_s26 = smov 8  }
 0x77b   : > { %2235 = dma.vmem_to_hbm [thread:$0]  (%p2244_p4), %s1777_s11, 256, %s2878_s9, [#allocation7], %s2405_s12, %s2405_s12, %s2406_s26  }
 0x77c   : > { %2381 = dma.done.wait (%p2244_p4), [#allocation7], 256  }
 0x77d   : > { %2383 = vsyncadd (%p2244_p4), [#allocation7], 4294967040 }
 0x77e PF: > { %s21_s30 = sadd.s32 1, %s2386_s30  }
 0x77f   : > { %p18_p3 = scmp.ge.s32.totalorder %s21_s30, 4  }
 0x781   :  { %20 = sbr.rel (!%p18_p3) target bundleno = 2 (0x2), region = 107 }
 0x788   :  { %1792 = vsyncpa [#allocation6], 1 }
 0x789   :  { %1794 = vsyncpa [#allocation6 + $0x1], 1 }
 0x78a   :  { %1795 = vsyncpa [#allocation7], 1 }
 0x78b   :  { %1797 = vsyncpa [#allocation7 + $0x1], 1 }

</bundles_post_ra>
